<compile_context>
chip_gen: v6e
topology: v6e:2x2x1
jax: 0.10.0
libtpu: 0.0.40
codegen_flags: <defaults>
</compile_context>

<pallas_src>
import math

import jax
import jax.numpy as jnp
from jax.experimental import pallas as pl
from jax.experimental.pallas import tpu as pltpu


def _round_up(x, m):
    return ((x + m - 1) // m) * m


def _cross_attn_kernel(q_in_ref, k_in_ref, v_in_ref,
                       wq_ref, bq_ref, wk_ref, bk_ref, wv_ref, bv_ref,
                       out_ref, prob_ref):
    tb, lq, dq = q_in_ref.shape
    _, lk, de = k_in_ref.shape
    dm = wq_ref.shape[1]
    compute_dtype = q_in_ref.dtype           # activations arrive pre-cast (bf16)

    # Flatten the batch tile into the matmul M dimension so each projection is a
    # single (tb*L, D) x (D, d_model) MXU matmul instead of `tb` tiny ones.
    # (Lq is padded to a multiple of 8 by the wrapper, so these reshapes are free.)
    q_in = q_in_ref[...].reshape(tb * lq, dq)
    k_in = k_in_ref[...].reshape(tb * lk, de)
    v_in = v_in_ref[...].reshape(tb * lk, de)

    # Projections: bf16 operands, f32 accumulation; bias added in f32.
    # NOTE: 1/sqrt(dim_k) is already folded into Wq/bq by the wrapper.
    q = jnp.dot(q_in, wq_ref[...], preferred_element_type=jnp.float32) + bq_ref[...]
    k = jnp.dot(k_in, wk_ref[...], preferred_element_type=jnp.float32) + bk_ref[...]
    v = jnp.dot(v_in, wv_ref[...], preferred_element_type=jnp.float32) + bv_ref[...]

    q = q.reshape(tb, lq, dm).astype(compute_dtype)
    k = k.reshape(tb, lk, dm).astype(compute_dtype)
    v = v.reshape(tb, lk, dm).astype(compute_dtype)

    # Scores: batched contraction over the feature axis of BOTH operands — lowers
    # to dot_general with batch dims, no k.T / XLU transpose.
    scores = jnp.einsum("bqd,bkd->bqk", q, k,
                        preferred_element_type=jnp.float32)          # (tb, lq, lk) f32

    # Numerically stable softmax along the key axis; all VPU math stays f32
    # (v5e has no bf16 VPU/EUP). The divide goes through the EUP reciprocal slot.
    m = jnp.max(scores, axis=-1, keepdims=True)
    e = jnp.exp(scores - m)
    denom = jnp.sum(e, axis=-1, keepdims=True)
    prob = e * pl.reciprocal(denom, approx=True)                      # (tb, lq, lk) f32

    out = jnp.einsum("bqk,bkd->bqd", prob.astype(compute_dtype), v,
                     preferred_element_type=jnp.float32)              # (tb, lq, dm) f32

    # Lane-dense stores: out_ref / prob_ref last dims are padded up to multiples of
    # 128 by the wrapper, so pad the values and do a single unmasked full-block store.
    lk_out = prob_ref.shape[-1]
    dm_out = out_ref.shape[-1]
    if lk_out > lk:
        prob = jnp.pad(prob, ((0, 0), (0, 0), (0, lk_out - lk)))
    if dm_out > dm:
        out = jnp.pad(out, ((0, 0), (0, 0), (0, dm_out - dm)))
    prob_ref[...] = prob.astype(prob_ref.dtype)
    out_ref[...] = out.astype(out_ref.dtype)


def _tpu_defaults():
    """Per-generation tile targets / VMEM budgets (conservative if unknown)."""
    kind = ""
    try:
        kind = jax.devices()[0].device_kind.lower()
    except Exception:
        pass
    if "v6" in kind:
        # v6e: 128 MiB VMEM, single TC -> big per-step tiles, few grid steps.
        return dict(target_rows=512, vmem_cap=48 << 20, vmem_limit=96 << 20, num_cores=1)
    if "v5" in kind:
        # v5e: default scoped VMEM is only 16 MiB -> keep the working set small.
        return dict(target_rows=256, vmem_cap=14 << 20, vmem_limit=64 << 20, num_cores=1)
    # v7x / unknown: 64 MiB per TC, 2 TCs -> per-core budget, even grid split.
    return dict(target_rows=256, vmem_cap=20 << 20, vmem_limit=48 << 20, num_cores=2)


def _step_vmem_bytes(tb, lq, lk, dq, de, dm, lk_out, dm_out, compute_bytes):
    """Rough per-grid-step VMEM estimate (streamed operands double-buffered)."""
    f32 = 4
    acts_in = tb * (lq * dq + 2 * lk * de) * compute_bytes            # bf16 inputs
    weights = (dq + 2 * de) * dm * compute_bytes + 3 * dm * f32       # resident weights
    outs = tb * lq * (dm_out + lk_out) * f32                          # padded f32 outputs
    interm = tb * ((lq + 2 * lk) * dm * (f32 + compute_bytes)         # q/k/v f32 + bf16
                   + 3 * lq * lk * f32                                # scores, e, prob
                   + lq * (lk_out + dm_out) * f32)                    # padded copies
    return 2 * (acts_in + outs) + 2 * weights + interm


def _pick_batch_tile(B, lq, lk, dq, de, dm, lk_out, dm_out, compute_bytes,
                     target_rows, vmem_cap, num_cores):
    """Pick a batch tile: enough flattened (tb*Lq) rows to keep the MXU busy, under
    the per-core VMEM budget, with the grid length a multiple of num_cores so all
    TensorCores stay busy on v7x."""
    divisors = [d for d in range(1, B + 1) if B % d == 0]
    ok = [d for d in divisors
          if _step_vmem_bytes(d, lq, lk, dq, de, dm, lk_out, dm_out,
                              compute_bytes) <= vmem_cap]
    if not ok:
        return 1
    reach = [d for d in ok if d * lq >= target_rows]
    tb = min(reach) if reach else max(ok)
    if num_cores > 1 and (B // tb) % num_cores != 0:
        even = [d for d in ok if d <= tb and (B // d) % num_cores == 0]
        if even:
            tb = max(even)
    return tb


def cross_attention_layer(query_input, key_input, value_input, params, *,
                          d_model, num_heads, compute_dtype=jnp.bfloat16):
    """query_input: (B, Lq, decoder_dim); key/value_input: (B, Lk, encoder_output_dim)."""
    wq, bq, wk, bk, wv, bv = (params["wq"], params["bq"], params["wk"],
                              params["bk"], params["wv"], params["bv"])
    B, Lq, Dq = query_input.shape
    _, Lk, De = key_input.shape
    dim_k = d_model // num_heads
    inv_sqrt_dk = 1.0 / math.sqrt(dim_k)

    gen = _tpu_defaults()

    # Fold 1/sqrt(dim_k) into the query projection (zero in-kernel cost), and
    # pre-cast the small reused weights so the MXU runs bf16 operands with f32
    # accumulation.  Biases stay f32 (added after accumulation).
    wq_c = (wq * inv_sqrt_dk).astype(compute_dtype)
    bq_c = (bq * inv_sqrt_dk).astype(jnp.float32)
    wk_c = wk.astype(compute_dtype)
    bk_c = bk.astype(jnp.float32)
    wv_c = wv.astype(compute_dtype)
    bv_c = bv.astype(jnp.float32)

    # Stream activations as bf16 (they are only ever used as MXU operands) — halves
    # inbound DMA bytes vs streaming f32 and casting in-kernel.
    q_act = query_input.astype(compute_dtype)
    k_act = key_input.astype(compute_dtype)
    v_act = value_input.astype(compute_dtype)

    # Pad Lq to a sublane multiple so the in-kernel flatten/unflatten reshapes are
    # layout no-ops (padded query rows are garbage and sliced off below).
    Lq_pad = _round_up(Lq, 8)
    if Lq_pad != Lq:
        q_act = jnp.pad(q_act, ((0, 0), (0, Lq_pad - Lq), (0, 0)))

    # Lane-dense output slabs: pad the last dims up to multiples of 128 so the kernel
    # issues full unmasked vector stores; the wrapper slices the padding off.
    dm_out = _round_up(d_model, 128)
    lk_out = _round_up(Lk, 128)

    compute_bytes = jnp.dtype(compute_dtype).itemsize
    tb = _pick_batch_tile(B, Lq_pad, Lk, Dq, De, d_model, lk_out, dm_out, compute_bytes,
                          target_rows=gen["target_rows"], vmem_cap=gen["vmem_cap"],
                          num_cores=gen["num_cores"])
    grid = (B // tb,)

    # NOTE: for very long Lk where the (Lq, Lk) score tile no longer fits VMEM
    # (esp. v7x's 64 MiB/TC), this kernel would need a flash-style Lk grid axis with
    # online softmax; not needed here since `prob` is a full module output anyway.

    out_shapes = (
        jax.ShapeDtypeStruct((B, Lq_pad, dm_out), jnp.float32),
        jax.ShapeDtypeStruct((B, Lq_pad, lk_out), jnp.float32),
    )
    out_specs = [
        pl.BlockSpec((tb, Lq_pad, dm_out), lambda b: (b, 0, 0)),  # weighted_attention
        pl.BlockSpec((tb, Lq_pad, lk_out), lambda b: (b, 0, 0)),  # prob
    ]

    def _in_specs(single_buffer_weights):
        # Constant index_map: same VMEM block reused across all grid steps (no
        # per-step re-DMA).  Single-buffering drops the useless second buffer.
        wkw = dict(pipeline_mode=pl.Buffered(1)) if single_buffer_weights else {}
        return [
            pl.BlockSpec((tb, Lq_pad, Dq), lambda b: (b, 0, 0)),       # query_input (bf16)
            pl.BlockSpec((tb, Lk, De), lambda b: (b, 0, 0)),           # key_input   (bf16)
            pl.BlockSpec((tb, Lk, De), lambda b: (b, 0, 0)),           # value_input (bf16)
            pl.BlockSpec((Dq, d_model), lambda b: (0, 0), **wkw),      # Wq (pre-scaled, bf16)
            pl.BlockSpec((1, d_model), lambda b: (0, 0), **wkw),       # bq (pre-scaled, f32)
            pl.BlockSpec((De, d_model), lambda b: (0, 0), **wkw),      # Wk (bf16)
            pl.BlockSpec((1, d_model), lambda b: (0, 0), **wkw),       # bk (f32)
            pl.BlockSpec((De, d_model), lambda b: (0, 0), **wkw),      # Wv (bf16)
            pl.BlockSpec((1, d_model), lambda b: (0, 0), **wkw),       # bv (f32)
        ]

    def _call(single_buffer_weights):
        grid_spec = pltpu.PrefetchScalarGridSpec(
            num_scalar_prefetch=0,
            grid=grid,
            in_specs=_in_specs(single_buffer_weights),
            out_specs=out_specs,
        )
        return pl.pallas_call(
            _cross_attn_kernel,
            out_shape=out_shapes,
            grid_spec=grid_spec,
            compiler_params=pltpu.CompilerParams(
                dimension_semantics=("parallel",),
                vmem_limit_bytes=gen["vmem_limit"]),
        )(q_act, k_act, v_act, wq_c, bq_c, wk_c, bk_c, wv_c, bv_c)

    try:
        out_p, prob_p = _call(True)
        jax.block_until_ready((out_p, prob_p))
    except Exception:
        # pl.Buffered(1) single-buffering not accepted on this jax version/backend —
        # fall back to default double-buffered weight blocks (identical semantics).
        out_p, prob_p = _call(False)

    # Strip the Lq / lane padding (no-op slices when already aligned).
    out = out_p[:, :Lq, :d_model]
    prob = prob_p[:, :Lq, :Lk]
    return out, prob


def init_params(key, encoder_output_dim, decoder_dim, d_model):
    """Deterministic synthetic init (PyTorch Linear shapes, stored as (in, out))."""
    k1, k2, k3, k4, k5, k6 = jax.random.split(key, 6)

    def uniform(k, shape, fan_in):
        bound = 1.0 / math.sqrt(fan_in)
        return jax.random.uniform(k, shape, jnp.float32, -bound, bound)

    return {
        "wq": uniform(k1, (decoder_dim, d_model), decoder_dim),
        "bq": uniform(k2, (1, d_model), decoder_dim),
        "wk": uniform(k3, (encoder_output_dim, d_model), encoder_output_dim),
        "bk": uniform(k4, (1, d_model), encoder_output_dim),
        "wv": uniform(k5, (encoder_output_dim, d_model), encoder_output_dim),
        "bv": uniform(k6, (1, d_model), encoder_output_dim),
    }


def reference(query_input, key_input, value_input, params, *, d_model, num_heads):
    dim_k = d_model // num_heads
    q = query_input @ params["wq"] + params["bq"]
    k = key_input @ params["wk"] + params["bk"]
    v = value_input @ params["wv"] + params["bv"]
    s = jnp.einsum("bqd,bkd->bqk", q, k) / math.sqrt(dim_k)
    p = jax.nn.softmax(s, axis=-1)
    return jnp.einsum("bqk,bkd->bqd", p, v), p


if __name__ == "__main__":
    # Small deterministic example shapes.
    B = 2
    Lq = 8              # decoder (query) sequence length
    Lk = 16             # encoder (key/value) sequence length
    decoder_dim = 32
    encoder_output_dim = 24
    d_model = 32
    num_heads = 4

    root = jax.random.PRNGKey(0)
    kp, kq, kk, kv = jax.random.split(root, 4)

    params = init_params(kp, encoder_output_dim, decoder_dim, d_model)
    query_input = jax.random.normal(kq, (B, Lq, decoder_dim), jnp.float32)
    key_input = jax.random.normal(kk, (B, Lk, encoder_output_dim), jnp.float32)
    value_input = jax.random.normal(kv, (B, Lk, encoder_output_dim), jnp.float32)

    out, prob = cross_attention_layer(
        query_input, key_input, value_input, params,
        d_model=d_model, num_heads=num_heads)
    jax.block_until_ready((out, prob))

    # Sanity-check against a plain-JAX f32 reference.  Tolerances are relaxed
    # because the kernel uses bf16 MXU operands and an approximate reciprocal.
    ref_out, ref_prob = reference(
        query_input, key_input, value_input, params,
        d_model=d_model, num_heads=num_heads)
    assert jnp.allclose(out, ref_out, atol=2e-2, rtol=2e-2)
    assert jnp.allclose(prob, ref_prob, atol=2e-2, rtol=2e-2)

    print("KERNEL_OK")
</pallas_src>

<mosaic_0001>
module attributes {stable_mosaic.version = 11 : i64} {
  func.func @_cross_attn_kernel(%arg0: i32, %arg1: memref<1x8x32xbf16, #tpu.memory_space<vmem>>, %arg2: memref<1x16x24xbf16, #tpu.memory_space<vmem>>, %arg3: memref<1x16x24xbf16, #tpu.memory_space<vmem>>, %arg4: memref<32x32xbf16, #tpu.memory_space<vmem>>, %arg5: memref<1x32xf32, #tpu.memory_space<vmem>>, %arg6: memref<24x32xbf16, #tpu.memory_space<vmem>>, %arg7: memref<1x32xf32, #tpu.memory_space<vmem>>, %arg8: memref<24x32xbf16, #tpu.memory_space<vmem>>, %arg9: memref<1x32xf32, #tpu.memory_space<vmem>>, %arg10: memref<1x8x128xf32, #tpu.memory_space<vmem>>, %arg11: memref<1x8x128xf32, #tpu.memory_space<vmem>>) attributes {dimension_semantics = [#tpu.dimension_semantics<parallel>], iteration_bounds = array<i64: 2>, scalar_prefetch = 0 : i64, scratch_operands = 0 : i64, tpu.core_type = #tpu.core_type<tc>, window_params = [{transform_indices = @transform_0, window_bounds = array<i64: 1, 8, 32>}, {transform_indices = @transform_1, window_bounds = array<i64: 1, 16, 24>}, {transform_indices = @transform_2, window_bounds = array<i64: 1, 16, 24>}, {pipeline_mode = #tpu.pipeline_mode<synchronous>, transform_indices = @transform_3, window_bounds = array<i64: 32, 32>}, {pipeline_mode = #tpu.pipeline_mode<synchronous>, transform_indices = @transform_4, window_bounds = array<i64: 1, 32>}, {pipeline_mode = #tpu.pipeline_mode<synchronous>, transform_indices = @transform_5, window_bounds = array<i64: 24, 32>}, {pipeline_mode = #tpu.pipeline_mode<synchronous>, transform_indices = @transform_6, window_bounds = array<i64: 1, 32>}, {pipeline_mode = #tpu.pipeline_mode<synchronous>, transform_indices = @transform_7, window_bounds = array<i64: 24, 32>}, {pipeline_mode = #tpu.pipeline_mode<synchronous>, transform_indices = @transform_8, window_bounds = array<i64: 1, 32>}, {transform_indices = @transform_9, window_bounds = array<i64: 1, 8, 128>}, {transform_indices = @transform_10, window_bounds = array<i64: 1, 8, 128>}]} {
    %c0 = arith.constant 0 : index
    %c0_0 = arith.constant 0 : index
    %c0_1 = arith.constant 0 : index
    %0 = vector.load %arg1[%c0, %c0_0, %c0_1] : memref<1x8x32xbf16, #tpu.memory_space<vmem>>, vector<1x8x32xbf16>
    %1 = vector.shape_cast %0 : vector<1x8x32xbf16> to vector<8x32xbf16>
    %c0_2 = arith.constant 0 : index
    %c0_3 = arith.constant 0 : index
    %c0_4 = arith.constant 0 : index
    %2 = vector.load %arg2[%c0_2, %c0_3, %c0_4] : memref<1x16x24xbf16, #tpu.memory_space<vmem>>, vector<1x16x24xbf16>
    %3 = vector.shape_cast %2 : vector<1x16x24xbf16> to vector<16x24xbf16>
    %c0_5 = arith.constant 0 : index
    %c0_6 = arith.constant 0 : index
    %c0_7 = arith.constant 0 : index
    %4 = vector.load %arg3[%c0_5, %c0_6, %c0_7] : memref<1x16x24xbf16, #tpu.memory_space<vmem>>, vector<1x16x24xbf16>
    %5 = vector.shape_cast %4 : vector<1x16x24xbf16> to vector<16x24xbf16>
    %c0_8 = arith.constant 0 : index
    %c0_9 = arith.constant 0 : index
    %6 = vector.load %arg4[%c0_8, %c0_9] : memref<32x32xbf16, #tpu.memory_space<vmem>>, vector<32x32xbf16>
    %cst = arith.constant dense<0.000000e+00> : vector<8x32xf32>
    %7 = tpu.matmul %1, %6, %cst {dimension_numbers = #tpu.dot_dimension_numbers<[1], [0], [0], [1], [0, 0, 1, 1], [], []>} : vector<8x32xbf16>, vector<32x32xbf16>, vector<8x32xf32> -> vector<8x32xf32>
    %c0_10 = arith.constant 0 : index
    %c0_11 = arith.constant 0 : index
    %8 = vector.load %arg5[%c0_10, %c0_11] : memref<1x32xf32, #tpu.memory_space<vmem>>, vector<1x32xf32>
    %9 = vector.broadcast %8 : vector<1x32xf32> to vector<8x32xf32>
    %10 = arith.addf %7, %9 : vector<8x32xf32>
    %c0_12 = arith.constant 0 : index
    %c0_13 = arith.constant 0 : index
    %11 = vector.load %arg6[%c0_12, %c0_13] : memref<24x32xbf16, #tpu.memory_space<vmem>>, vector<24x32xbf16>
    %cst_14 = arith.constant dense<0.000000e+00> : vector<16x32xf32>
    %12 = tpu.matmul %3, %11, %cst_14 {dimension_numbers = #tpu.dot_dimension_numbers<[1], [0], [0], [1], [0, 0, 1, 1], [], []>} : vector<16x24xbf16>, vector<24x32xbf16>, vector<16x32xf32> -> vector<16x32xf32>
    %c0_15 = arith.constant 0 : index
    %c0_16 = arith.constant 0 : index
    %13 = vector.load %arg7[%c0_15, %c0_16] : memref<1x32xf32, #tpu.memory_space<vmem>>, vector<1x32xf32>
    %14 = vector.broadcast %13 : vector<1x32xf32> to vector<16x32xf32>
    %15 = arith.addf %12, %14 : vector<16x32xf32>
    %c0_17 = arith.constant 0 : index
    %c0_18 = arith.constant 0 : index
    %16 = vector.load %arg8[%c0_17, %c0_18] : memref<24x32xbf16, #tpu.memory_space<vmem>>, vector<24x32xbf16>
    %cst_19 = arith.constant dense<0.000000e+00> : vector<16x32xf32>
    %17 = tpu.matmul %5, %16, %cst_19 {dimension_numbers = #tpu.dot_dimension_numbers<[1], [0], [0], [1], [0, 0, 1, 1], [], []>} : vector<16x24xbf16>, vector<24x32xbf16>, vector<16x32xf32> -> vector<16x32xf32>
    %c0_20 = arith.constant 0 : index
    %c0_21 = arith.constant 0 : index
    %18 = vector.load %arg9[%c0_20, %c0_21] : memref<1x32xf32, #tpu.memory_space<vmem>>, vector<1x32xf32>
    %19 = vector.broadcast %18 : vector<1x32xf32> to vector<16x32xf32>
    %20 = arith.addf %17, %19 : vector<16x32xf32>
    %21 = vector.shape_cast %10 : vector<8x32xf32> to vector<1x8x32xf32>
    %22 = arith.truncf %21 : vector<1x8x32xf32> to vector<1x8x32xbf16>
    %23 = vector.shape_cast %15 : vector<16x32xf32> to vector<1x16x32xf32>
    %24 = arith.truncf %23 : vector<1x16x32xf32> to vector<1x16x32xbf16>
    %25 = vector.shape_cast %20 : vector<16x32xf32> to vector<1x16x32xf32>
    %26 = arith.truncf %25 : vector<1x16x32xf32> to vector<1x16x32xbf16>
    "tpu.trace_start"() <{level = 10 : i32, message = "bqd,bkd->bqk"}> : () -> ()
    %cst_22 = arith.constant dense<0.000000e+00> : vector<1x8x16xf32>
    %27 = tpu.matmul %22, %24, %cst_22 {dimension_numbers = #tpu.dot_dimension_numbers<[2], [2], [1], [1], [0, 0, 0, 1, 1, 1], [0], [0]>} : vector<1x8x32xbf16>, vector<1x16x32xbf16>, vector<1x8x16xf32> -> vector<1x8x16xf32>
    "tpu.trace_stop"() : () -> ()
    %cst_23 = arith.constant dense<0xFF800000> : vector<1x8xf32>
    %28 = vector.multi_reduction <maximumf>, %27, %cst_23 [2] : vector<1x8x16xf32> to vector<1x8xf32>
    %29 = vector.shape_cast %28 : vector<1x8xf32> to vector<1x8x1xf32>
    %30 = vector.broadcast %29 : vector<1x8x1xf32> to vector<1x8x16xf32>
    %31 = arith.subf %27, %30 : vector<1x8x16xf32>
    %32 = math.exp %31 : vector<1x8x16xf32>
    %cst_24 = arith.constant dense<0.000000e+00> : vector<1x8xf32>
    %33 = vector.multi_reduction <add>, %32, %cst_24 [2] : vector<1x8x16xf32> to vector<1x8xf32>
    %34 = vector.shape_cast %33 : vector<1x8xf32> to vector<1x8x1xf32>
    %35 = tpu.reciprocal %34 {approx = true} : vector<1x8x1xf32> -> vector<1x8x1xf32>
    %36 = vector.broadcast %35 : vector<1x8x1xf32> to vector<1x8x16xf32>
    %37 = arith.mulf %32, %36 : vector<1x8x16xf32>
    %38 = arith.truncf %37 : vector<1x8x16xf32> to vector<1x8x16xbf16>
    "tpu.trace_start"() <{level = 10 : i32, message = "bqk,bkd->bqd"}> : () -> ()
    %cst_25 = arith.constant dense<0.000000e+00> : vector<1x8x32xf32>
    %39 = tpu.matmul %38, %26, %cst_25 {dimension_numbers = #tpu.dot_dimension_numbers<[2], [1], [1], [2], [0, 0, 0, 1, 1, 2], [0], [0]>} : vector<1x8x16xbf16>, vector<1x16x32xbf16>, vector<1x8x32xf32> -> vector<1x8x32xf32>
    %c0_i32 = arith.constant 0 : i32
    "tpu.trace_stop"() : () -> ()
    %40 = arith.sitofp %c0_i32 : i32 to f32
    %41 = vector.broadcast %40 : f32 to vector<1x8x112xf32>
    %42 = tpu.concatenate %37, %41 in 2 : vector<1x8x16xf32>, vector<1x8x112xf32> -> vector<1x8x128xf32>
    %c0_i32_26 = arith.constant 0 : i32
    %43 = arith.sitofp %c0_i32_26 : i32 to f32
    %44 = vector.broadcast %43 : f32 to vector<1x8x96xf32>
    %45 = tpu.concatenate %39, %44 in 2 : vector<1x8x32xf32>, vector<1x8x96xf32> -> vector<1x8x128xf32>
    %c0_27 = arith.constant 0 : index
    %c0_28 = arith.constant 0 : index
    %c0_29 = arith.constant 0 : index
    %46 = vector.load %arg11[%c0_27, %c0_28, %c0_29] : memref<1x8x128xf32, #tpu.memory_space<vmem>>, vector<1x8x128xf32>
    tpu.vector_store %arg11[%c0_27, %c0_28, %c0_29], %42 {strides = array<i32>} : memref<1x8x128xf32, #tpu.memory_space<vmem>>, vector<1x8x128xf32>,
    %c0_30 = arith.constant 0 : index
    %c0_31 = arith.constant 0 : index
    %c0_32 = arith.constant 0 : index
    %47 = vector.load %arg10[%c0_30, %c0_31, %c0_32] : memref<1x8x128xf32, #tpu.memory_space<vmem>>, vector<1x8x128xf32>
    tpu.vector_store %arg10[%c0_30, %c0_31, %c0_32], %45 {strides = array<i32>} : memref<1x8x128xf32, #tpu.memory_space<vmem>>, vector<1x8x128xf32>,
    return
  }
  func.func @transform_0(%arg0: i32) -> (i32, i32, i32) {
    %c0_i32 = arith.constant 0 : i32
    %c0_i32_0 = arith.constant 0 : i32
    %c0_i32_1 = arith.constant 0 : i32
    return %arg0, %c0_i32, %c0_i32_0 : i32, i32, i32
  }
  func.func @transform_1(%arg0: i32) -> (i32, i32, i32) {
    %c0_i32 = arith.constant 0 : i32
    %c0_i32_0 = arith.constant 0 : i32
    %c0_i32_1 = arith.constant 0 : i32
    return %arg0, %c0_i32, %c0_i32_0 : i32, i32, i32
  }
  func.func @transform_2(%arg0: i32) -> (i32, i32, i32) {
    %c0_i32 = arith.constant 0 : i32
    %c0_i32_0 = arith.constant 0 : i32
    %c0_i32_1 = arith.constant 0 : i32
    return %arg0, %c0_i32, %c0_i32_0 : i32, i32, i32
  }
  func.func @transform_3(%arg0: i32) -> (i32, i32) {
    %c0_i32 = arith.constant 0 : i32
    %c0_i32_0 = arith.constant 0 : i32
    %c0_i32_1 = arith.constant 0 : i32
    return %c0_i32, %c0_i32_0 : i32, i32
  }
  func.func @transform_4(%arg0: i32) -> (i32, i32) {
    %c0_i32 = arith.constant 0 : i32
    %c0_i32_0 = arith.constant 0 : i32
    %c0_i32_1 = arith.constant 0 : i32
    return %c0_i32, %c0_i32_0 : i32, i32
  }
  func.func @transform_5(%arg0: i32) -> (i32, i32) {
    %c0_i32 = arith.constant 0 : i32
    %c0_i32_0 = arith.constant 0 : i32
    %c0_i32_1 = arith.constant 0 : i32
    return %c0_i32, %c0_i32_0 : i32, i32
  }
  func.func @transform_6(%arg0: i32) -> (i32, i32) {
    %c0_i32 = arith.constant 0 : i32
    %c0_i32_0 = arith.constant 0 : i32
    %c0_i32_1 = arith.constant 0 : i32
    return %c0_i32, %c0_i32_0 : i32, i32
  }
  func.func @transform_7(%arg0: i32) -> (i32, i32) {
    %c0_i32 = arith.constant 0 : i32
    %c0_i32_0 = arith.constant 0 : i32
    %c0_i32_1 = arith.constant 0 : i32
    return %c0_i32, %c0_i32_0 : i32, i32
  }
  func.func @transform_8(%arg0: i32) -> (i32, i32) {
    %c0_i32 = arith.constant 0 : i32
    %c0_i32_0 = arith.constant 0 : i32
    %c0_i32_1 = arith.constant 0 : i32
    return %c0_i32, %c0_i32_0 : i32, i32
  }
  func.func @transform_9(%arg0: i32) -> (i32, i32, i32) {
    %c0_i32 = arith.constant 0 : i32
    %c0_i32_0 = arith.constant 0 : i32
    %c0_i32_1 = arith.constant 0 : i32
    return %arg0, %c0_i32, %c0_i32_0 : i32, i32, i32
  }
  func.func @transform_10(%arg0: i32) -> (i32, i32, i32) {
    %c0_i32 = arith.constant 0 : i32
    %c0_i32_0 = arith.constant 0 : i32
    %c0_i32_1 = arith.constant 0 : i32
    return %arg0, %c0_i32, %c0_i32_0 : i32, i32, i32
  }
}

module attributes {stable_mosaic.version = 11 : i64} {
  func.func @_cross_attn_kernel(%arg0: i32, %arg1: memref<1x8x32xbf16, #tpu.memory_space<vmem>>, %arg2: memref<1x16x24xbf16, #tpu.memory_space<vmem>>, %arg3: memref<1x16x24xbf16, #tpu.memory_space<vmem>>, %arg4: memref<32x32xbf16, #tpu.memory_space<vmem>>, %arg5: memref<1x32xf32, #tpu.memory_space<vmem>>, %arg6: memref<24x32xbf16, #tpu.memory_space<vmem>>, %arg7: memref<1x32xf32, #tpu.memory_space<vmem>>, %arg8: memref<24x32xbf16, #tpu.memory_space<vmem>>, %arg9: memref<1x32xf32, #tpu.memory_space<vmem>>, %arg10: memref<1x8x128xf32, #tpu.memory_space<vmem>>, %arg11: memref<1x8x128xf32, #tpu.memory_space<vmem>>) attributes {dimension_semantics = [#tpu.dimension_semantics<parallel>], iteration_bounds = array<i64: 2>, scalar_prefetch = 0 : i64, scratch_operands = 0 : i64, tpu.core_type = #tpu.core_type<tc>, window_params = [{transform_indices = @transform_0, window_bounds = array<i64: 1, 8, 32>}, {transform_indices = @transform_1, window_bounds = array<i64: 1, 16, 24>}, {transform_indices = @transform_2, window_bounds = array<i64: 1, 16, 24>}, {pipeline_mode = #tpu.pipeline_mode<synchronous>, transform_indices = @transform_3, window_bounds = array<i64: 32, 32>}, {pipeline_mode = #tpu.pipeline_mode<synchronous>, transform_indices = @transform_4, window_bounds = array<i64: 1, 32>}, {pipeline_mode = #tpu.pipeline_mode<synchronous>, transform_indices = @transform_5, window_bounds = array<i64: 24, 32>}, {pipeline_mode = #tpu.pipeline_mode<synchronous>, transform_indices = @transform_6, window_bounds = array<i64: 1, 32>}, {pipeline_mode = #tpu.pipeline_mode<synchronous>, transform_indices = @transform_7, window_bounds = array<i64: 24, 32>}, {pipeline_mode = #tpu.pipeline_mode<synchronous>, transform_indices = @transform_8, window_bounds = array<i64: 1, 32>}, {transform_indices = @transform_9, window_bounds = array<i64: 1, 8, 128>}, {transform_indices = @transform_10, window_bounds = array<i64: 1, 8, 128>}]} {
    %c0 = arith.constant 0 : index
    %c0_0 = arith.constant 0 : index
    %c0_1 = arith.constant 0 : index
    %0 = vector.load %arg1[%c0, %c0_0, %c0_1] : memref<1x8x32xbf16, #tpu.memory_space<vmem>>, vector<1x8x32xbf16>
    %1 = vector.shape_cast %0 : vector<1x8x32xbf16> to vector<8x32xbf16>
    %c0_2 = arith.constant 0 : index
    %c0_3 = arith.constant 0 : index
    %c0_4 = arith.constant 0 : index
    %2 = vector.load %arg2[%c0_2, %c0_3, %c0_4] : memref<1x16x24xbf16, #tpu.memory_space<vmem>>, vector<1x16x24xbf16>
    %3 = vector.shape_cast %2 : vector<1x16x24xbf16> to vector<16x24xbf16>
    %c0_5 = arith.constant 0 : index
    %c0_6 = arith.constant 0 : index
    %c0_7 = arith.constant 0 : index
    %4 = vector.load %arg3[%c0_5, %c0_6, %c0_7] : memref<1x16x24xbf16, #tpu.memory_space<vmem>>, vector<1x16x24xbf16>
    %5 = vector.shape_cast %4 : vector<1x16x24xbf16> to vector<16x24xbf16>
    %c0_8 = arith.constant 0 : index
    %c0_9 = arith.constant 0 : index
    %6 = vector.load %arg4[%c0_8, %c0_9] : memref<32x32xbf16, #tpu.memory_space<vmem>>, vector<32x32xbf16>
    %cst = arith.constant dense<0.000000e+00> : vector<8x32xf32>
    %7 = tpu.matmul %1, %6, %cst {dimension_numbers = #tpu.dot_dimension_numbers<[1], [0], [0], [1], [0, 0, 1, 1], [], []>} : vector<8x32xbf16>, vector<32x32xbf16>, vector<8x32xf32> -> vector<8x32xf32>
    %c0_10 = arith.constant 0 : index
    %c0_11 = arith.constant 0 : index
    %8 = vector.load %arg5[%c0_10, %c0_11] : memref<1x32xf32, #tpu.memory_space<vmem>>, vector<1x32xf32>
    %9 = vector.broadcast %8 : vector<1x32xf32> to vector<8x32xf32>
    %10 = arith.addf %7, %9 : vector<8x32xf32>
    %c0_12 = arith.constant 0 : index
    %c0_13 = arith.constant 0 : index
    %11 = vector.load %arg6[%c0_12, %c0_13] : memref<24x32xbf16, #tpu.memory_space<vmem>>, vector<24x32xbf16>
    %cst_14 = arith.constant dense<0.000000e+00> : vector<16x32xf32>
    %12 = tpu.matmul %3, %11, %cst_14 {dimension_numbers = #tpu.dot_dimension_numbers<[1], [0], [0], [1], [0, 0, 1, 1], [], []>} : vector<16x24xbf16>, vector<24x32xbf16>, vector<16x32xf32> -> vector<16x32xf32>
    %c0_15 = arith.constant 0 : index
    %c0_16 = arith.constant 0 : index
    %13 = vector.load %arg7[%c0_15, %c0_16] : memref<1x32xf32, #tpu.memory_space<vmem>>, vector<1x32xf32>
    %14 = vector.broadcast %13 : vector<1x32xf32> to vector<16x32xf32>
    %15 = arith.addf %12, %14 : vector<16x32xf32>
    %c0_17 = arith.constant 0 : index
    %c0_18 = arith.constant 0 : index
    %16 = vector.load %arg8[%c0_17, %c0_18] : memref<24x32xbf16, #tpu.memory_space<vmem>>, vector<24x32xbf16>
    %cst_19 = arith.constant dense<0.000000e+00> : vector<16x32xf32>
    %17 = tpu.matmul %5, %16, %cst_19 {dimension_numbers = #tpu.dot_dimension_numbers<[1], [0], [0], [1], [0, 0, 1, 1], [], []>} : vector<16x24xbf16>, vector<24x32xbf16>, vector<16x32xf32> -> vector<16x32xf32>
    %c0_20 = arith.constant 0 : index
    %c0_21 = arith.constant 0 : index
    %18 = vector.load %arg9[%c0_20, %c0_21] : memref<1x32xf32, #tpu.memory_space<vmem>>, vector<1x32xf32>
    %19 = vector.broadcast %18 : vector<1x32xf32> to vector<16x32xf32>
    %20 = arith.addf %17, %19 : vector<16x32xf32>
    %21 = vector.shape_cast %10 : vector<8x32xf32> to vector<1x8x32xf32>
    %22 = arith.truncf %21 : vector<1x8x32xf32> to vector<1x8x32xbf16>
    %23 = vector.shape_cast %15 : vector<16x32xf32> to vector<1x16x32xf32>
    %24 = arith.truncf %23 : vector<1x16x32xf32> to vector<1x16x32xbf16>
    %25 = vector.shape_cast %20 : vector<16x32xf32> to vector<1x16x32xf32>
    %26 = arith.truncf %25 : vector<1x16x32xf32> to vector<1x16x32xbf16>
    "tpu.trace_start"() <{level = 10 : i32, message = "bqd,bkd->bqk"}> : () -> ()
    %cst_22 = arith.constant dense<0.000000e+00> : vector<1x8x16xf32>
    %27 = tpu.matmul %22, %24, %cst_22 {dimension_numbers = #tpu.dot_dimension_numbers<[2], [2], [1], [1], [0, 0, 0, 1, 1, 1], [0], [0]>} : vector<1x8x32xbf16>, vector<1x16x32xbf16>, vector<1x8x16xf32> -> vector<1x8x16xf32>
    "tpu.trace_stop"() : () -> ()
    %cst_23 = arith.constant dense<0xFF800000> : vector<1x8xf32>
    %28 = vector.multi_reduction <maximumf>, %27, %cst_23 [2] : vector<1x8x16xf32> to vector<1x8xf32>
    %29 = vector.shape_cast %28 : vector<1x8xf32> to vector<1x8x1xf32>
    %30 = vector.broadcast %29 : vector<1x8x1xf32> to vector<1x8x16xf32>
    %31 = arith.subf %27, %30 : vector<1x8x16xf32>
    %32 = math.exp %31 : vector<1x8x16xf32>
    %cst_24 = arith.constant dense<0.000000e+00> : vector<1x8xf32>
    %33 = vector.multi_reduction <add>, %32, %cst_24 [2] : vector<1x8x16xf32> to vector<1x8xf32>
    %34 = vector.shape_cast %33 : vector<1x8xf32> to vector<1x8x1xf32>
    %35 = tpu.reciprocal %34 {approx = true} : vector<1x8x1xf32> -> vector<1x8x1xf32>
    %36 = vector.broadcast %35 : vector<1x8x1xf32> to vector<1x8x16xf32>
    %37 = arith.mulf %32, %36 : vector<1x8x16xf32>
    %38 = arith.truncf %37 : vector<1x8x16xf32> to vector<1x8x16xbf16>
    "tpu.trace_start"() <{level = 10 : i32, message = "bqk,bkd->bqd"}> : () -> ()
    %cst_25 = arith.constant dense<0.000000e+00> : vector<1x8x32xf32>
    %39 = tpu.matmul %38, %26, %cst_25 {dimension_numbers = #tpu.dot_dimension_numbers<[2], [1], [1], [2], [0, 0, 0, 1, 1, 2], [0], [0]>} : vector<1x8x16xbf16>, vector<1x16x32xbf16>, vector<1x8x32xf32> -> vector<1x8x32xf32>
    %c0_i32 = arith.constant 0 : i32
    "tpu.trace_stop"() : () -> ()
    %40 = arith.sitofp %c0_i32 : i32 to f32
    %41 = vector.broadcast %40 : f32 to vector<1x8x112xf32>
    %42 = tpu.concatenate %37, %41 in 2 : vector<1x8x16xf32>, vector<1x8x112xf32> -> vector<1x8x128xf32>
    %c0_i32_26 = arith.constant 0 : i32
    %43 = arith.sitofp %c0_i32_26 : i32 to f32
    %44 = vector.broadcast %43 : f32 to vector<1x8x96xf32>
    %45 = tpu.concatenate %39, %44 in 2 : vector<1x8x32xf32>, vector<1x8x96xf32> -> vector<1x8x128xf32>
    %c0_27 = arith.constant 0 : index
    %c0_28 = arith.constant 0 : index
    %c0_29 = arith.constant 0 : index
    %46 = vector.load %arg11[%c0_27, %c0_28, %c0_29] : memref<1x8x128xf32, #tpu.memory_space<vmem>>, vector<1x8x128xf32>
    tpu.vector_store %arg11[%c0_27, %c0_28, %c0_29], %42 {strides = array<i32>} : memref<1x8x128xf32, #tpu.memory_space<vmem>>, vector<1x8x128xf32>,
    %c0_30 = arith.constant 0 : index
    %c0_31 = arith.constant 0 : index
    %c0_32 = arith.constant 0 : index
    %47 = vector.load %arg10[%c0_30, %c0_31, %c0_32] : memref<1x8x128xf32, #tpu.memory_space<vmem>>, vector<1x8x128xf32>
    tpu.vector_store %arg10[%c0_30, %c0_31, %c0_32], %45 {strides = array<i32>} : memref<1x8x128xf32, #tpu.memory_space<vmem>>, vector<1x8x128xf32>,
    return
  }
  func.func @transform_0(%arg0: i32) -> (i32, i32, i32) {
    %c0_i32 = arith.constant 0 : i32
    %c0_i32_0 = arith.constant 0 : i32
    %c0_i32_1 = arith.constant 0 : i32
    return %arg0, %c0_i32, %c0_i32_0 : i32, i32, i32
  }
  func.func @transform_1(%arg0: i32) -> (i32, i32, i32) {
    %c0_i32 = arith.constant 0 : i32
    %c0_i32_0 = arith.constant 0 : i32
    %c0_i32_1 = arith.constant 0 : i32
    return %arg0, %c0_i32, %c0_i32_0 : i32, i32, i32
  }
  func.func @transform_2(%arg0: i32) -> (i32, i32, i32) {
    %c0_i32 = arith.constant 0 : i32
    %c0_i32_0 = arith.constant 0 : i32
    %c0_i32_1 = arith.constant 0 : i32
    return %arg0, %c0_i32, %c0_i32_0 : i32, i32, i32
  }
  func.func @transform_3(%arg0: i32) -> (i32, i32) {
    %c0_i32 = arith.constant 0 : i32
    %c0_i32_0 = arith.constant 0 : i32
    %c0_i32_1 = arith.constant 0 : i32
    return %c0_i32, %c0_i32_0 : i32, i32
  }
  func.func @transform_4(%arg0: i32) -> (i32, i32) {
    %c0_i32 = arith.constant 0 : i32
    %c0_i32_0 = arith.constant 0 : i32
    %c0_i32_1 = arith.constant 0 : i32
    return %c0_i32, %c0_i32_0 : i32, i32
  }
  func.func @transform_5(%arg0: i32) -> (i32, i32) {
    %c0_i32 = arith.constant 0 : i32
    %c0_i32_0 = arith.constant 0 : i32
    %c0_i32_1 = arith.constant 0 : i32
    return %c0_i32, %c0_i32_0 : i32, i32
  }
  func.func @transform_6(%arg0: i32) -> (i32, i32) {
    %c0_i32 = arith.constant 0 : i32
    %c0_i32_0 = arith.constant 0 : i32
    %c0_i32_1 = arith.constant 0 : i32
    return %c0_i32, %c0_i32_0 : i32, i32
  }
  func.func @transform_7(%arg0: i32) -> (i32, i32) {
    %c0_i32 = arith.constant 0 : i32
    %c0_i32_0 = arith.constant 0 : i32
    %c0_i32_1 = arith.constant 0 : i32
    return %c0_i32, %c0_i32_0 : i32, i32
  }
  func.func @transform_8(%arg0: i32) -> (i32, i32) {
    %c0_i32 = arith.constant 0 : i32
    %c0_i32_0 = arith.constant 0 : i32
    %c0_i32_1 = arith.constant 0 : i32
    return %c0_i32, %c0_i32_0 : i32, i32
  }
  func.func @transform_9(%arg0: i32) -> (i32, i32, i32) {
    %c0_i32 = arith.constant 0 : i32
    %c0_i32_0 = arith.constant 0 : i32
    %c0_i32_1 = arith.constant 0 : i32
    return %arg0, %c0_i32, %c0_i32_0 : i32, i32, i32
  }
  func.func @transform_10(%arg0: i32) -> (i32, i32, i32) {
    %c0_i32 = arith.constant 0 : i32
    %c0_i32_0 = arith.constant 0 : i32
    %c0_i32_1 = arith.constant 0 : i32
    return %arg0, %c0_i32, %c0_i32_0 : i32, i32, i32
  }
}

</mosaic_0001>

<bundles_post_ra>
// kernel: tpu_custom_call.1
= control target key start
LH: loop header
LB: loop body
LE: loop exit
PB: predicated region body
PF: predicated region fallthrough
CT: control target
= control target key end

     0   :  { %s1987_s0 = inlined_call_operand.hbm [shape: bf16[2,8,32], index: 0, kind: input, shape index: {}]   ;;  %s1988_s1 = inlined_call_operand.hbm [shape: bf16[2,16,24], index: 1, kind: input, shape index: {}]   ;;  %s1989_s2 = inlined_call_operand.hbm [shape: bf16[2,16,24], index: 2, kind: input, shape index: {}]   ;;  %s1990_s3 = inlined_call_operand.hbm [shape: bf16[32,32], index: 3, kind: input, shape index: {}]   ;;  %s1991_s4 = inlined_call_operand.hbm [shape: f32[1,32], index: 4, kind: input, shape index: {}]   ;;  %s1992_s5 = inlined_call_operand.hbm [shape: bf16[24,32], index: 5, kind: input, shape index: {}]   ;;  %s1993_s6 = inlined_call_operand.hbm [shape: f32[1,32], index: 6, kind: input, shape index: {}]   ;;  %s1994_s7 = inlined_call_operand.vmem [shape: bf16[24,32], index: 7, kind: input, shape index: {}]   ;;  %s1995_s8 = inlined_call_operand.vmem [shape: f32[1,32], index: 8, kind: input, shape index: {}]   ;;  %s1996_s9 = inlined_call_operand.hbm [shape: f32[2,8,128], index: 9, kind: output, shape index: {0}]   ;;  %s1997_s10 = inlined_call_operand.hbm [shape: f32[2,8,128], index: 10, kind: output, shape index: {1}]  }
   0x1   :  { %2017 = sst [smem:[#allocation28_spill]] %s1988_s1 }
   0x2   :  { %2018 = sst [smem:[#allocation29_spill]] %s1990_s3 }
   0x3   :  { %2019 = sst [smem:[#allocation30_spill]] %s1991_s4 }
   0x4   :  { %2020 = sst [smem:[#allocation31_spill]] %s1992_s5 }
   0x5   :  { %2021 = sst [smem:[#allocation32_spill]] %s1993_s6 }
   0x6   :  { %2022 = sst [smem:[#allocation33_spill]] %s1996_s9 }
   0x7   :  { %2023 = sst [smem:[#allocation34_spill]] %s1997_s10 }
   0x8   :  { %16 = vsyncpa [#allocation3], 0 }
   0x9   :  { %18 = vsyncpa [#allocation3 + $0x1], 0 }
   0xa   :  { %19 = vsyncpa [#allocation6], 0 }
   0xb   :  { %21 = vsyncpa [#allocation6 + $0x1], 0 }
   0xc   :  { %22 = vsyncpa [#allocation9], 0 }
   0xd   :  { %23 = vsyncpa [#allocation12], 0 }
   0xe   :  { %24 = vsyncpa [#allocation4], 0 }
   0xf   :  { %26 = vsyncpa [#allocation4 + $0x1], 0 }
  0x10   :  { %27 = vsyncpa [#allocation16], 0 }
  0x11   :  { %29 = vsyncpa [#allocation16 + $0x1], 0  ;;  %s1638_s13 = smov 0   ;;  %s1640_s14 = smov 0  }
  0x12   :  { %s1642_s15 = smov 0   ;;  %s1644_s16 = smov 0  }
  0x13 LB: > { %2024 = sst [smem:[#allocation23_spill]] %s1556_s13  ;;  %s1659_s17 = sadd.s32 4294967295, %s1568_s16   ;;  %s1568_s16 = sphi %s1644_s16, %s2060_s16   ;;  %s1564_s15 = sphi %s1642_s15, %s2062_s15   ;;  %s1560_s14 = sphi %s1640_s14, %s2064_s14   ;;  %s1556_s13 = sphi %s1638_s13, %s2063_s13  }
  0x14   : > { %2025 = sst [smem:[#allocation24_spill]] %s1564_s15  ;;  %s1058_s18 = sadd.s32 4294967294, %s1568_s16  }
  0x15   : > { %p55_p0 = scmp.ne.s32.totalorder %s1560_s14, %s1556_s13  ;;  %p2008_p1 = scmp.eq.s32.totalorder %s1659_s17, 0 }
  0x16   : > { %p257_p2 = scmp.eq.s32.totalorder %s1659_s17, 1  ;;  %p263_p3 = scmp.eq.s32.totalorder %s1058_s18, 1 }
  0x17   : > { %p1668_p4 = por %p2008_p1, %p55_p0  ;;  %p1059_p5 = scmp.ge.s32.totalorder %s1568_s16, 1 }
  0x18   : > { %p1673_p6 = por %p263_p3, %p55_p0  ;;  %p296_p7 = scmp.lt.s32.totalorder %s1568_s16, 3 }
  0x19   : > { %s2026_s19 = scalar_select %p1668_p4, 1, 0 }
  0x1a   : > { %s2027_s20 = scalar_select %p1673_p6, 1, 0 }
  0x1b   : > { %p1678_p8 = pnand %p1059_p5, %p296_p7  ;;  %s1570_s22 = smov [#allocation8]  }
  0x1c   : > { %2028 = sst [smem:[#allocation25_spill]] %s2027_s20  ;;  %s308_s23 = sshll.u32 %s1570_s22, 4  ;;  %s309_s23 = int_to_ptr.vmem [resolvable:$true] %s308_s23 }
  0x1d   : > { %s2029_s21 = scalar_select %p1678_p8, 1, 0 }
  0x1e   : > { %p1182_p9 = pneg %p1678_p8  ;;  %s1571_s25 = smov [#allocation11]  }
  0x1f   : > { %s332_s26 = sshll.u32 %s1571_s25, 4  ;;  %s1285_s27 = scalar_lea.vmem %s309_s23, 256  ;;  %s333_s26 = int_to_ptr.vmem [resolvable:$true] %s332_s26 }
  0x20   : > { %p1687_p11 = pnand %p1182_p9, %p2008_p1  ;;  %p1286_p13 = scmp.ne.s32.totalorder %s309_s23, %s1285_s27 }
  0x21   : > { %p1293_p5 = scmp.lt.s32.totalorder %s309_s23, %s309_s23  ;;  %p1294_p7 = scmp.lt.s32.totalorder %s1285_s27, %s1285_s27 }
  0x22   : > { %s2030_s24 = scalar_select %p1687_p11, 1, 0 }
  0x23   : > { %p2009_p12 = pneg %p1687_p11  ;;  %p1295_p10 = por %p1294_p7, %p1293_p5 }
  0x25   : > { %p1288_p0 = pnand %p1286_p13, %p2009_p12 }
  0x27   : > { %p1289_p3 = pneg %p1288_p0 }
  0x29   : > { %p1296_p9 = pnand %p1295_p10, %p1289_p3 }
  0x2b   : > { %1299 = shalt.err (!%p1296_p9)
}
  0x2c   : > { %s1998_s28 = smov 64   ;;  %s2000_s29 = smov 4  }
  0x2d   : > { %s2031_s3 = sld [smem:[#allocation29_spill]]  ;;  %s1311_s12 = scalar_lea.vmem %s333_s26, 192 }
  0x2e   : > { %p1312_p13 = scmp.ne.s32.totalorder %s333_s26, %s1311_s12  ;;  %p1319_p10 = scmp.lt.s32.totalorder %s333_s26, %s333_s26 }
  0x2f   : > { %p1320_p3 = scmp.lt.s32.totalorder %s1311_s12, %s1311_s12 }
  0x30   : > { %p1314_p0 = pnand %p1312_p13, %p2009_p12 }
  0x31   : > { %p1321_p7 = por %p1320_p3, %p1319_p10 }
  0x32   : > { %p1315_p5 = pneg %p1314_p0 }
  0x33   : > { %1185 = dma.hbm_to_vmem [thread:$0]  (!%p1687_p11), %s2031_s3, 256, %s309_s23, [#allocation9], %s1998_s28, %s1998_s28, %s2000_s29  }
  0x34   : > { %p1322_p9 = pnand %p1321_p7, %p1315_p5 }
  0x36   : > { %1325 = shalt.err (!%p1322_p9)
}
  0x37   : > { %s2032_s5 = sld [smem:[#allocation31_spill]]  ;;  %s1716_s23 = sadd.s32 1, %s1568_s16  }
  0x38   : > { %2033 = sst [smem:[#allocation26_spill]] %s1716_s23  ;;  %s42_s25 = sadd.s32 1, %s1564_s15 }
  0x39   : > { %s39_s27 = ssub.s32 %s1568_s16, %s1716_s23  ;;  %p49_p13 = scmp.ne.s32.totalorder %s1564_s15, %s1560_s14 }
  0x3a   : > { %p40_p0 = scmp.eq.s32.totalorder %s39_s27, 0  ;;  %p50_p5 = scmp.eq.s32.totalorder %s1568_s16, 0 }
  0x3b   : > { %p1726_p10 = por %p257_p2, %p49_p13  ;;  %p1216_p3 = scmp.lt.s32.totalorder %s1568_s16, 2 }
  0x3c   : > { %s1732_s11 = scalar_select %p40_p0, %s1564_s15, %s42_s25  }
  0x3d   : > { %1191 = dma.hbm_to_vmem [thread:$0]  (!%p1687_p11), %s2032_s5, 192, %s333_s26, [#allocation12], %s1998_s28, %s1998_s28, %s2000_s29  }
  0x3e   : > { %s2034_s30 = scalar_select %p1726_p10, 1, 0 }
  0x3f   : > { %2035 = sst [smem:[#allocation27_spill]] %s1732_s11  ;;  %p51_p7 = por %p50_p5, %p49_p13 }
  0x40   : > { %s1735_s12 = sand.u32 1, %s1564_s15   ;;  %s381_s26 = sand.u32 1, %s1568_s16  }
  0x41   : > { %s2007_s18 = sshll.u32 %s1735_s12, 3  ;;  %p1739_p9 = pnand %p1216_p3, %p51_p7 }
  0x42   : > { %s1105_s27 = sshll.u32 %s1568_s16, 7  ;;  %s2037_s1 = sld [smem:[#allocation28_spill]] }
  0x43   : > { %s385_s25 = scalar_lea.vmem [#allocation5], %s2007_s18  ;;  %s1756_s23 = scalar_lea.hbm %s1989_s2, %s1105_s27 }
  0x44   : > { %s392_s5 = sshll.u32 %s385_s25, 4  ;;  %s1758_s20 = scalar_lea.sflag [#allocation6], %s381_s26  ;;  %s1751_s5 = int_to_ptr.vmem [resolvable:$true] %s392_s5 }
  0x45   : > { %p1764_p13 = pneg %p1739_p9 }
  0x48   : > { %s1747_s3 = scalar_lea.hbm %s2037_s1, %s1105_s27  ;;  %s1331_s18 = scalar_lea.hbm %s2037_s1, 256 }
  0x49   : > { %s1326_s13 = scalar_lea.hbm %s1747_s3, 128  ;;  %p1332_p3 = scmp.lt.s32.totalorder %s1747_s3, %s2037_s1 }
  0x4a   : > { %p1327_p2 = scmp.ne.s32.totalorder %s1747_s3, %s1326_s13  ;;  %p1333_p7 = scmp.lt.s32.totalorder %s1331_s18, %s1326_s13 }
  0x4c   : > { %p1329_p0 = pnand %p1764_p13, %p1327_p2  ;;  %p1334_p1 = por %p1333_p7, %p1332_p3 }
  0x4e   : > { %p1330_p5 = pneg %p1329_p0 }
  0x50   : > { %p1335_p12 = pnand %p1334_p1, %p1330_p5 }
  0x52   : > { %1338 = shalt.err (!%p1335_p12)
}
  0x53   : > { %s1339_s26 = scalar_lea.vmem %s1751_s5, 128  ;;  %s1574_s27 = smov [#allocation5]  }
  0x54   : > { %p1340_p6 = scmp.ne.s32.totalorder %s1751_s5, %s1339_s26  ;;  %s1344_s29 = sshll.u32 %s1574_s27, 4  ;;  %s1345_s29 = int_to_ptr.vmem [resolvable:$false] %s1344_s29 }
  0x55   : > { %s1346_s25 = scalar_lea.vmem %s1345_s29, 256  ;;  %p1347_p10 = scmp.lt.s32.totalorder %s1751_s5, %s1345_s29 }
  0x56   : > { %p1342_p2 = pnand %p1340_p6, %p1764_p13  ;;  %p1348_p4 = scmp.lt.s32.totalorder %s1346_s25, %s1339_s26 }
  0x58   : > { %p1343_p0 = pneg %p1342_p2  ;;  %p1349_p8 = por %p1348_p4, %p1347_p10 }
  0x5a   : > { %p1350_p11 = pnand %p1349_p8, %p1343_p0 }
  0x5c   : > { %1353 = shalt.err (!%p1350_p11)
}
  0x5d   : > { %s2039_s13 = smov 4   ;;  %s2040_s18 = smov 64  }
  0x5e   : > { %1201 = dma.hbm_to_vmem [thread:$0]  (!%p1739_p9), %s1747_s3, 128, %s1751_s5, %s1758_s20, %s2040_s18, %s2040_s18, %s2039_s13  }
  0x5f   : > { %s2041_s15 = sshll.u32 %s1735_s12, 3  ;;  %s1575_s26 = smov [#allocation10]  }
  0x60   : > { %s406_s11 = scalar_lea.vmem [#allocation7], %s2041_s15  ;;  %s322_s29 = sshll.u32 %s1575_s26, 4  ;;  %s323_s29 = int_to_ptr.vmem [resolvable:$true] %s322_s29 }
  0x61   : > { %s413_s27 = sshll.u32 %s406_s11, 4  ;;  %s1365_s25 = scalar_lea.vmem %s323_s29, 16  ;;  %s1792_s27 = int_to_ptr.vmem [resolvable:$true] %s413_s27 }
  0x62   : > { %p1366_p1 = scmp.ne.s32.totalorder %s323_s29, %s1365_s25  ;;  %p2042_p4 = scmp.ne.s32.totalorder %s2030_s24, 0 }
  0x63   : > { %s1372_s1 = scalar_lea.vmem %s323_s29, 32  ;;  %p1373_p12 = scmp.lt.s32.totalorder %s323_s29, %s323_s29 }
  0x64   : > { %p2043_p6 = pneg %p2042_p4  ;;  %p1374_p10 = scmp.lt.s32.totalorder %s1372_s1, %s1365_s25 }
  0x66   : > { %p1368_p8 = pnand %p1366_p1, %p2043_p6  ;;  %p1375_p5 = por %p1374_p10, %p1373_p12 }
  0x68   : > { %p1369_p11 = pneg %p1368_p8 }
  0x6a   : > { %p1376_p3 = pnand %p1375_p5, %p1369_p11 }
  0x6c   : > { %1379 = shalt.err (!%p1376_p3)
}
  0x6d   : > { %s2044_s4 = sld [smem:[#allocation30_spill]]  ;;  %s1576_s15 = smov [#allocation13]  }
  0x6e   : > { %s346_s11 = sshll.u32 %s1576_s15, 4  ;;  %s1065_s26 = sshll.u32 %s1735_s12, 2  ;;  %s347_s11 = int_to_ptr.vmem [resolvable:$true] %s346_s11 }
  0x6f   : > { %s1391_s9 = scalar_lea.vmem %s347_s11, 16  ;;  %p2045_p2 = pmov %p2043_p6 }
  0x70   : > { %p1392_p7 = scmp.ne.s32.totalorder %s347_s11, %s1391_s9  ;;  %s1398_s1 = scalar_lea.vmem %s347_s11, 32 }
  0x71   : > { %p1399_p6 = scmp.lt.s32.totalorder %s347_s11, %s347_s11  ;;  %p1400_p8 = scmp.lt.s32.totalorder %s1398_s1, %s1391_s9 }
  0x72   : > { %p1394_p0 = pnand %p1392_p7, %p2045_p2 }
  0x73   : > { %1188 = dma.hbm_to_vmem [thread:$0]  (!%p2042_p4), %s2044_s4, 16, %s323_s29, [#allocation9]  }
  0x74   : > { %p1395_p1 = pneg %p1394_p0  ;;  %p1401_p11 = por %p1400_p8, %p1399_p6 }
  0x76   : > { %p1402_p12 = pnand %p1401_p11, %p1395_p1 }
  0x78   : > { %1405 = shalt.err (!%p1402_p12)
}
  0x79   : > { %s2046_s6 = sld [smem:[#allocation32_spill]]  ;;  %s1066_s3 = sshll.u32 %s1568_s16, 6 }
  0x7a   : > { %s1815_s4 = scalar_lea.hbm %s1987_s0, %s1066_s3  ;;  %s367_s9 = scalar_lea.vmem [#allocation2], %s1065_s26 }
  0x7b   : > { %s374_s1 = sshll.u32 %s367_s9, 4  ;;  %s364_s24 = scalar_lea.sflag [#allocation3], %s1735_s12  ;;  %s375_s1 = int_to_ptr.vmem [resolvable:$true] %s374_s1 }
  0x7c   : > { %s1406_s10 = scalar_lea.hbm %s1815_s4, 64  ;;  %s1411_s29 = scalar_lea.hbm %s1987_s0, 128 }
  0x7d   : > { %p1407_p10 = scmp.ne.s32.totalorder %s1815_s4, %s1406_s10  ;;  %p1413_p7 = scmp.lt.s32.totalorder %s1411_s29, %s1406_s10 }
  0x7f   : > { %1194 = dma.hbm_to_vmem [thread:$0]  (!%p2042_p4), %s2046_s6, 16, %s347_s11, [#allocation12]  }
  0x80   : > { %p1409_p5 = pnand %p1407_p10, %p1764_p13  ;;  %p1412_p4 = scmp.lt.s32.totalorder %s1815_s4, %s1987_s0 }
  0x82   : > { %p1410_p3 = pneg %p1409_p5  ;;  %p1414_p2 = por %p1413_p7, %p1412_p4 }
  0x84   : > { %p1415_p0 = pnand %p1414_p2, %p1410_p3 }
  0x86   : > { %1418 = shalt.err (!%p1415_p0)
}
  0x87   : > { %s1419_s26 = scalar_lea.vmem %s375_s1, 64  ;;  %s1577_s12 = smov [#allocation2]  }
  0x88   : > { %p1420_p1 = scmp.ne.s32.totalorder %s375_s1, %s1419_s26  ;;  %s1424_s3 = sshll.u32 %s1577_s12, 4  ;;  %s1425_s3 = int_to_ptr.vmem [resolvable:$false] %s1424_s3 }
  0x89   : > { %s1426_s15 = scalar_lea.vmem %s1425_s3, 128  ;;  %p1427_p11 = scmp.lt.s32.totalorder %s375_s1, %s1425_s3 }
  0x8a   : > { %p1422_p6 = pnand %p1420_p1, %p1764_p13  ;;  %p1428_p12 = scmp.lt.s32.totalorder %s1426_s15, %s1419_s26 }
  0x8c   : > { %p1423_p8 = pneg %p1422_p6  ;;  %p1429_p10 = por %p1428_p12, %p1427_p11 }
  0x8e   : > { %p1430_p5 = pnand %p1429_p10, %p1423_p8 }
  0x90   : > { %1433 = shalt.err (!%p1430_p5)
}
  0x91   : > { %1198 = dma.hbm_to_vmem [thread:$0]  (!%p1739_p9), %s1815_s4, 64, %s375_s1, %s364_s24  }
  0x92   : > { %s1434_s6 = scalar_lea.hbm %s1756_s23, 128  ;;  %s1439_s25 = scalar_lea.hbm %s1989_s2, 256 }
  0x93   : > { %p1435_p3 = scmp.ne.s32.totalorder %s1756_s23, %s1434_s6  ;;  %p1440_p2 = scmp.lt.s32.totalorder %s1756_s23, %s1989_s2 }
  0x94   : > { %p1441_p0 = scmp.lt.s32.totalorder %s1439_s25, %s1434_s6 }
  0x95   : > { %p1437_p4 = pnand %p1435_p3, %p1764_p13 }
  0x96   : > { %p1442_p1 = por %p1441_p0, %p1440_p2 }
  0x97   : > { %p1438_p7 = pneg %p1437_p4 }
  0x99   : > { %p1443_p6 = pnand %p1442_p1, %p1438_p7 }
  0x9b   : > { %1446 = shalt.err (!%p1443_p6)
}
  0x9c   : > { %s1447_s4 = scalar_lea.vmem %s1792_s27, 128  ;;  %s1578_s1 = smov [#allocation7]  }
  0x9d   : > { %p1448_p8 = scmp.ne.s32.totalorder %s1792_s27, %s1447_s4  ;;  %s1452_s24 = sshll.u32 %s1578_s1, 4  ;;  %s1453_s24 = int_to_ptr.vmem [resolvable:$false] %s1452_s24 }
  0x9e   : > { %s1454_s5 = scalar_lea.vmem %s1453_s24, 256  ;;  %p1455_p10 = scmp.lt.s32.totalorder %s1792_s27, %s1453_s24 }
  0x9f   : > { %p1450_p11 = pnand %p1448_p8, %p1764_p13  ;;  %p1456_p5 = scmp.lt.s32.totalorder %s1454_s5, %s1447_s4 }
  0xa1   : > { %p1451_p12 = pneg %p1450_p11  ;;  %p1457_p3 = por %p1456_p5, %p1455_p10 }
  0xa3   : > { %p1458_p4 = pnand %p1457_p3, %p1451_p12 }
  0xa5   : > { %1461 = shalt.err (!%p1458_p4)
}
  0xa6   : > { %1204 = dma.hbm_to_vmem [thread:$0]  (!%p1739_p9), %s1756_s23, 128, %s1792_s27, %s1758_s20, %s2040_s18, %s2040_s18, %s2039_s13  }
  0xa7   : > { %p2047_p13 = scmp.ne.s32.totalorder %s2029_s21, 0 }
  0xa8   : > { %s1861_s28 = sand.u32 (!%p2047_p13), 1, %s1560_s14   ;;  %p2048_p7 = scmp.ne.s32.totalorder (!%p2047_p13), %s2026_s19, 0 }
  0xa9   : > { %425 = sbr.rel (%p2047_p13) target bundleno = 1120 (0x460), region = 56  ;;  %s1074_s26 = sshll.u32 (!%p2047_p13), %s1861_s28, 2 }
  0xaa   : > { %s428_s12 = scalar_lea.sflag (!%p2047_p13), [#allocation3], %s1861_s28  ;;  %s1865_s3 = scalar_lea.vmem (!%p2047_p13), [#allocation2], %s1074_s26 }
  0xae   : > { %1531 = dma.done.wait (%p2048_p7), %s428_s12, 64  }
  0xaf   : > { %1533 = vsyncadd (%p2048_p7), %s428_s12, 4294967232  ;;  %s436_s20 = sand.u32 1, %s1659_s17   ;;  %s1873_s21 = sshll.u32 %s1861_s28, 3 }
  0xb0   : > { %s437_s23 = scalar_lea.sflag [#allocation6], %s436_s20  ;;  %s440_s22 = scalar_lea.vmem [#allocation5], %s1873_s21 }
  0xb1   : > { %1535 = dma.done.wait (%p2048_p7), %s437_s23, 256  }
  0xb2   : > { %1537 = vsyncadd (%p2048_p7), %s437_s23, 4294967040  ;;  %s449_s13 = scalar_lea.vmem [#allocation7], %s1873_s21  ;;  %p2049_p9 = scmp.eq.s32.totalorder %s1659_s17, 0 }
  0xb4   : > { %1539 = dma.done.wait (%p2049_p9), [#allocation9], 272   ;;  %p2050_p2 = pmov %p2049_p9 }
  0xb6   : > { %1541 = vsyncadd (%p2050_p2), [#allocation9], 4294967024  ;;  %p2051_p0 = pmov %p2050_p2 }
  0xb8   : > { %1543 = dma.done.wait (%p2051_p0), [#allocation12], 208   ;;  %p2052_p1 = pmov %p2051_p0 }
  0xb9   : > { %v1579_v0 = vmov 0.0   ;;  %vm1580_vm0 = vmmov 0   ;;  %vm618_vm1 = vcmask 1043456   ;;  %v1262_v1 = vld [vmem:[#allocation11 + $0x8] ss:$0 sps:$4 sm:$0xff]   ;;  %v1264_v3 = vld [vmem:[#allocation11] sm:$0xff]  }
  0xba   : > { %1545 = vsyncadd (%p2052_p1), [#allocation12], 4294967088  ;;  %1128 = vmatprep.subr.bf16.mxu1 %v1579_v0  ;;  %1120 = vmatprep.subr.bf16.mxu0 %v1579_v0  ;;  %v620_v2 = vsel %vm618_vm1, %v1262_v1, 0  ;;  %v1265_v4 = vld [vmem:[#allocation8 + $0x8] sm:$0xff]   ;;  %v1263_v5 = vld [vmem:[%s1994_s7 + $0x8] ss:$0 sps:$4 sm:$0xff]  }
  0xbb   : > { %1132 = vmatprep.mubr.msk.bf16.mxu1 %vm1580_vm0, %v1579_v0  ;;  %1124 = vmatprep.mubr.msk.bf16.mxu0 %vm1580_vm0, %v1579_v0  ;;  %v1266_v6 = vld [vmem:[%s440_s22] sm:$0xff]   ;;  %vm614_vm2 = vcmask 195584   ;;  %v518_v8 = vld [vmem:[%s1865_s3] sm:$0xf]  ;;  %vm546_vm3 = vcmask 261120   ;;  %v691_v9 = vsel %vm618_vm1, %v1263_v5, 0 }
  0xbc   : > { %1129 = vmatpush3.bf16.msra.mxu1 %v620_v2  ;;  %1121 = vmatpush3.bf16.msra.mxu0 %v1265_v4  ;;  %v1267_v7 = vld [vmem:[#allocation8] sm:$0xff]   ;;  %v1087_v11 = vld [vmem:[#allocation13] ss:$0 sm:$0xff]  ;;  %v1083_v19 = vld [vmem:[#allocation10] ss:$0 sm:$0xff]  ;;  %vm783_vm4 = vcmask 130048  }
  0xbd   : > { %1130 = vmatprep.subr.bf16.mxu1 %v1579_v0  ;;  %1122 = vmatprep.subr.bf16.mxu0 %v1579_v0  ;;  %v1268_v26 = vld [vmem:[%s1994_s7] sm:$0xff]   ;;  %v1269_v27 = vld [vmem:[%s449_s13] sm:$0xff]   ;;  %s516_s9 = scalar_lea.vmem [#allocation15], %s1873_s21  ;;  %s1101_s25 = sshll.u32 %s1659_s17, 7 }
  0xbe   : > { %v1092_v40 = vld [vmem:[%s1995_s8] ss:$0 sm:$0xff]  ;;  %s2053_s4 = sld [smem:[#allocation34_spill]]  ;;  %s875_s24 = sshll.u32 %s516_s9, 4  ;;  %s876_s24 = int_to_ptr.vmem [resolvable:$true] %s875_s24 }
  0xbf   : > { %s849_s5 = scalar_lea.sflag [#allocation16], %s1861_s28  ;;  %s1462_s26 = scalar_lea.vmem %s876_s24, 128 }
  0xc0   : > { %1131 = vmatpush3.bf16.msra.mxu1 %v1264_v3  ;;  %1123 = vmatpush3.bf16.msra.mxu0 %v1267_v7  ;;  %p1463_p6 = scmp.ne.s32.totalorder %s876_s24, %s1462_s26  ;;  %p2054_p8 = scmp.ne.s32.totalorder %s2034_s30, 0 }
  0xc1   : > { %1144 = vmatprep.subr.bf16.mxu1 %v1579_v0  ;;  %1136 = vmatprep.subr.bf16.mxu0 %v1579_v0  ;;  %s1581_s12 = smov [#allocation15]  }
  0xc2   : > { %p1464_p11 = pnand %p1463_p6, %p2054_p8  ;;  %s1466_s3 = sshll.u32 %s1581_s12, 4  ;;  %s1467_s3 = int_to_ptr.vmem [resolvable:$false] %s1466_s3 }
  0xc3   : > { %1133 = vmatmul.mubr.msk.bf16.vlgmr.msra.gmra.mxu1 %vm614_vm2, %v1266_v6  ;;  %1125 = vmatmul.mubr.msk.bf16.vlgmr.msra.gmra.mxu0 %vm546_vm3, %v518_v8  ;;  %s1468_s20 = scalar_lea.vmem %s1467_s3, 256  ;;  %p1469_p10 = scmp.lt.s32.totalorder %s876_s24, %s1467_s3 }
  0xc4   : > { %1146 = vmatprep.mubr.msk.bf16.mxu1 %vm1580_vm0, %v1579_v0  ;;  %1137 = vmatpush3.bf16.msra.mxu0 %v691_v9  ;;  %s873_s1 = scalar_lea.hbm %s2053_s4, %s1101_s25  ;;  %p1465_p12 = pneg %p1464_p11 }
  0xc5   : > { %1140 = vmatprep.mubr.msk.bf16.mxu0 %vm1580_vm0, %v1579_v0  ;;  %1138 = vmatprep.subr.bf16.mxu0 %v1579_v0  ;;  %p1470_p5 = scmp.lt.s32.totalorder %s1468_s20, %s1462_s26 }
  0xc7   : > { %p1471_p3 = por %p1470_p5, %p1469_p10 }
  0xc8   : > { %1139 = vmatpush3.bf16.msra.mxu0 %v1268_v26 }
  0xc9   : > { %1150 = vmatprep.subr.bf16.mxu0 %v1579_v0  ;;  %p1472_p4 = pnand %p1471_p3, %p1465_p12 }
  0xcb   : > { %1141 = vmatmul.mubr.msk.bf16.vlgmr.msra.gmra.mxu0 %vm614_vm2, %v1269_v27 }
  0xcc   : > { %1152 = vmatprep.mubr.msk.bf16.mxu0 %vm1580_vm0, %v1579_v0 }
 0x183   : > { %v656_v10 = vpop.f32.mrf.mxu1  ;;  %v584_v13 = vpop.f32.mrf.mxu0 }
 0x184   : > { %v657_v16 = vadd.f32 %v1087_v11, %v656_v10  ;;  %v585_v23 = vadd.f32 %v1083_v19, %v584_v13 }
 0x185   : > { %v1134_v12 = vpop.f32.mrf.mxu1  ;;  %v1126_v15 = vpop.f32.mrf.mxu0 }
 0x186   : > { %v734_v25 = vpack.c.bf16 %v585_v23, %v585_v23 }
 0x187   : > { %v659_v14 = vpop.f32.mrf.mxu1  ;;  %v587_v20 = vpop.f32.mrf.mxu0 }
 0x188   : > { %v660_v17 = vadd.f32 %v1087_v11, %v659_v14 }
 0x189   : > { %v1135_v18 = vpop.f32.mrf.mxu1  ;;  %v1127_v22 = vpop.f32.mrf.mxu0 }
 0x18a   : > { %v735_v21 = vpack.c.bf16 %v660_v17, %v657_v16 }
 0x18b   : > { %v727_v33 = vpop.f32.mrf.mxu0 }
 0x18c   : > { %v741_v24 = vsel %vm546_vm3, %v735_v21, 0  ;;  %v728_v42 = vadd.f32 %v1092_v40, %v727_v33 }
 0x18d   : > { %1145 = vmatpush3.bf16.xpose.msra.mxu1 %v741_v24  ;;  %v1142_v34 = vpop.f32.mrf.mxu0 }
 0x18f   : > { %v730_v41 = vpop.f32.mrf.mxu0 }
 0x190   : > { %v731_v44 = vadd.f32 %v1092_v40, %v730_v41 }
 0x191   : > { %v1143_v43 = vpop.f32.mrf.mxu0 }
 0x192   : > { %v736_v45 = vpack.c.bf16 %v731_v44, %v728_v42 }
 0x194   : > { %1147 = vmatmul.mubr.msk.bf16.vlgmr.msra.gmra.mxu1 %vm546_vm3, %v734_v25  ;;  %1151 = vmatpush3.bf16.msra.mxu0 %v736_v45 }
 0x254   : > { %v777_v28 = vpop.f32.mrf.mxu1 }
 0x255   : > { %v784_v29 = vsel %vm783_vm4, %v777_v28, -inf }
 0x256   : > { %785 = vmax.xlane.f32.xlu0 %v784_v29  ;;  %v1148_v30 = vpop.f32.mrf.mxu1 }
 0x258   : > { %v780_v31 = vpop.f32.mrf.mxu1 }
 0x25a   : > { %v1149_v32 = vpop.f32.mrf.mxu1 }
 0x2df   : > { %v786_v35 = vpop.xlane.xlu0 %785 }
 0x2e0   : > { %v787_v36 = vsub.f32 %v777_v28, %v786_v35 }
 0x2e2   : > { %v788_v37 = vmul.f32 1.442695, %v787_v36 }
 0x2e4   : > { %1270 = vpow2.f32 %v788_v37 }
 0x2f1   : > { %v1271_v38 = vpop.eup %1270 }
 0x2f2   : > { %v790_v39 = vsel %vm783_vm4, %v1271_v38, 0.0 }
 0x2f3   : > { %791 = vadd.xlane.f32.xlu0 %v790_v39 }
 0x37c   : > { %v792_v46 = vpop.xlane.xlu0 %791 }
 0x37d   : > { %1272 = vrcp.f32 %v792_v46 }
 0x38a   : > { %v1273_v47 = vpop.eup %1272 }
 0x38b   : > { %v794_v48 = vmul.f32 %v1273_v47, %v1271_v38 }
 0x38d   : > { %v795_v49 = vpack.c.bf16 %v794_v48, %v794_v48  ;;  %v839_v50 = vsel %vm783_vm4, %v794_v48, 0.0 }
 0x38e   : > { %841 = vst [vmem:[%s516_s9] sm:$0xff] %v839_v50 }
 0x38f   : > { %1153 = vmatmul.mubr.msk.bf16.vlgmr.msra.gmra.mxu0 %vm783_vm4, %v795_v49 }
 0x390   : > { %1475 = shalt.err (!%p1472_p4)
}
 0x391   : > { %s1476_s23 = scalar_lea.hbm %s873_s1, 128  ;;  %s1480_s19 = scalar_lea.hbm %s2053_s4, 256 }
 0x392   : > { %p1477_p13 = scmp.ne.s32.totalorder %s873_s1, %s1476_s23  ;;  %p1481_p2 = scmp.lt.s32.totalorder %s873_s1, %s2053_s4 }
 0x393   : > { %p1482_p0 = scmp.lt.s32.totalorder %s1480_s19, %s1476_s23 }
 0x394   : > { %p1478_p7 = pnand %p1477_p13, %p2054_p8 }
 0x395   : > { %p1483_p1 = por %p1482_p0, %p1481_p2 }
 0x396   : > { %p1479_p9 = pneg %p1478_p7 }
 0x398   : > { %p1484_p6 = pnand %p1483_p1, %p1479_p9 }
 0x39a   : > { %1487 = shalt.err (!%p1484_p6)
}
 0x39b   : > { %1179 = dma.vmem_to_hbm [thread:$0]  (%p2054_p8), %s876_s24, 128, %s873_s1, %s849_s5  }
 0x39c   : > { %s509_s15 = scalar_lea.vmem [#allocation14], %s1873_s21  ;;  %s2055_s11 = sld [smem:[#allocation33_spill]] }
 0x39d   : > { %s862_s6 = sshll.u32 %s509_s15, 4  ;;  %s844_s26 = scalar_lea.sflag [#allocation4], %s1861_s28  ;;  %s1945_s6 = int_to_ptr.vmem [resolvable:$true] %s862_s6 }
 0x39e   : > { %s1488_s1 = scalar_lea.vmem %s1945_s6, 128  ;;  %s1582_s17 = smov [#allocation14]  }
 0x39f   : > { %p1489_p11 = scmp.ne.s32.totalorder %s1945_s6, %s1488_s1  ;;  %s1492_s21 = sshll.u32 %s1582_s17, 4  ;;  %s1493_s21 = int_to_ptr.vmem [resolvable:$false] %s1492_s21 }
 0x3a0   : > { %p1495_p5 = scmp.lt.s32.totalorder %s1945_s6, %s1493_s21 }
 0x3a1   : > { %p1490_p12 = pnand %p1489_p11, %p2054_p8 }
 0x3a2   : > { %s1943_s29 = scalar_lea.hbm %s2055_s11, %s1101_s25  ;;  %s1494_s25 = scalar_lea.vmem %s1493_s21, 256 }
 0x3a3   : > { %p1491_p10 = pneg %p1490_p12  ;;  %p1496_p3 = scmp.lt.s32.totalorder %s1494_s25, %s1488_s1 }
 0x3a5   : > { %p1497_p4 = por %p1496_p3, %p1495_p5 }
 0x3a7   : > { %p1498_p13 = pnand %p1497_p4, %p1491_p10 }
 0x44f   : > { %v833_v51 = vpop.f32.mrf.mxu0 }
 0x450   : > { %v840_v52 = vsel %vm546_vm3, %v833_v51, 0.0 }
 0x451   : > { %842 = vst [vmem:[%s509_s15] sm:$0xff] %v840_v52  ;;  %v1154_v53 = vpop.f32.mrf.mxu0 }
 0x452   : > { %1501 = shalt.err (!%p1498_p13)
}
 0x453   : > { %s1502_s24 = scalar_lea.hbm %s1943_s29, 128  ;;  %s1506_s12 = scalar_lea.hbm %s2055_s11, 256 }
 0x454   : > { %p1503_p7 = scmp.ne.s32.totalorder %s1943_s29, %s1502_s24  ;;  %p1507_p0 = scmp.lt.s32.totalorder %s1943_s29, %s2055_s11 }
 0x455   : > { %p1508_p1 = scmp.lt.s32.totalorder %s1506_s12, %s1502_s24 }
 0x456   : > { %p1504_p9 = pnand %p1503_p7, %p2054_p8 }
 0x457   : > { %p1509_p6 = por %p1508_p1, %p1507_p0 }
 0x458   : > { %p1505_p2 = pneg %p1504_p9 }
 0x45a   : > { %p1510_p11 = pnand %p1509_p6, %p1505_p2 }
 0x45c   : > { %1513 = shalt.err (!%p1510_p11)
}
 0x45d   : > { %1178 = dma.vmem_to_hbm [thread:$0]  (%p2054_p8), %s1945_s6, 128, %s1943_s29, %s844_s26   ;;  %v836_v54 = vpop.f32.mrf.mxu0 }
 0x45f   : > { %v1155_v55 = vpop.f32.mrf.mxu0 }
 0x460 PF: > { %s2056_s23 = sld [smem:[#allocation23_spill]]  ;;  %p2059_p10 = scmp.ge.s32.totalorder %s1568_s16, 2 }
 0x461   : > { %s2057_s22 = sld [smem:[#allocation25_spill]] }
 0x466   : > { %s887_s13 = sand.u32 1, %s2056_s23  }
 0x467   : > { %p2058_p12 = scmp.ne.s32.totalorder %s2057_s22, 0  ;;  %s888_s19 = scalar_lea.sflag [#allocation4], %s887_s13 }
 0x469   : > { %p1206_p5 = pnand %p2059_p10, %p2058_p12 }
 0x46b   : > { %p1207_p3 = pneg %p1206_p5 }
 0x46d   : > { %1547 = dma.done.wait (%p1207_p3), %s888_s19, 128  }
 0x46e   : > { %1549 = vsyncadd (%p1207_p3), %s888_s19, 4294967168  ;;  %s897_s18 = scalar_lea.sflag [#allocation16], %s887_s13 }
 0x46f   : > { %1551 = dma.done.wait (%p1207_p3), %s897_s18, 128  }
 0x470   : > { %1553 = vsyncadd (%p1207_p3), %s897_s18, 4294967168  ;;  %s2060_s16 = sld [smem:[#allocation26_spill]]  ;;  %s2063_s13 = smov %s1560_s14 }
 0x471   : > { %s2061_s30 = sld [smem:[#allocation24_spill]] }
 0x472   : > { %s2062_s15 = sld [smem:[#allocation27_spill]] }
 0x476   : > { %p32_p8 = scmp.ge.s32.totalorder %s2060_s16, 4  }
 0x477   : > { %s2064_s14 = smov %s2061_s30 }
 0x478   :  { %34 = sbr.rel (!%p32_p8) target bundleno = 19 (0x13), region = 158 }
 0x47d   :  { %902 = vsyncpa [#allocation3], 1 }
 0x47e   :  { %904 = vsyncpa [#allocation3 + $0x1], 1 }
 0x47f   :  { %905 = vsyncpa [#allocation6], 1 }
 0x480   :  { %907 = vsyncpa [#allocation6 + $0x1], 1 }
 0x481   :  { %908 = vsyncpa [#allocation9], 1 }
 0x482   :  { %909 = vsyncpa [#allocation12], 1 }
 0x483   :  { %910 = vsyncpa [#allocation4], 1 }
 0x484   :  { %912 = vsyncpa [#allocation4 + $0x1], 1 }
 0x485   :  { %913 = vsyncpa [#allocation16], 1 }
 0x486   :  { %915 = vsyncpa [#allocation16 + $0x1], 1 }

// kernel: tpu_custom_call.1
= control target key start
LH: loop header
LB: loop body
LE: loop exit
PB: predicated region body
PF: predicated region fallthrough
CT: control target
= control target key end

     0   :  { %s1987_s0 = inlined_call_operand.hbm [shape: bf16[2,8,32], index: 0, kind: input, shape index: {}]   ;;  %s1988_s1 = inlined_call_operand.hbm [shape: bf16[2,16,24], index: 1, kind: input, shape index: {}]   ;;  %s1989_s2 = inlined_call_operand.hbm [shape: bf16[2,16,24], index: 2, kind: input, shape index: {}]   ;;  %s1990_s3 = inlined_call_operand.hbm [shape: bf16[32,32], index: 3, kind: input, shape index: {}]   ;;  %s1991_s4 = inlined_call_operand.hbm [shape: f32[1,32], index: 4, kind: input, shape index: {}]   ;;  %s1992_s5 = inlined_call_operand.hbm [shape: bf16[24,32], index: 5, kind: input, shape index: {}]   ;;  %s1993_s6 = inlined_call_operand.hbm [shape: f32[1,32], index: 6, kind: input, shape index: {}]   ;;  %s1994_s7 = inlined_call_operand.vmem [shape: bf16[24,32], index: 7, kind: input, shape index: {}]   ;;  %s1995_s8 = inlined_call_operand.vmem [shape: f32[1,32], index: 8, kind: input, shape index: {}]   ;;  %s1996_s9 = inlined_call_operand.hbm [shape: f32[2,8,128], index: 9, kind: output, shape index: {0}]   ;;  %s1997_s10 = inlined_call_operand.hbm [shape: f32[2,8,128], index: 10, kind: output, shape index: {1}]  }
   0x1   :  { %2017 = sst [smem:[#allocation28_spill]] %s1988_s1 }
   0x2   :  { %2018 = sst [smem:[#allocation29_spill]] %s1990_s3 }
   0x3   :  { %2019 = sst [smem:[#allocation30_spill]] %s1991_s4 }
   0x4   :  { %2020 = sst [smem:[#allocation31_spill]] %s1992_s5 }
   0x5   :  { %2021 = sst [smem:[#allocation32_spill]] %s1993_s6 }
   0x6   :  { %2022 = sst [smem:[#allocation33_spill]] %s1996_s9 }
   0x7   :  { %2023 = sst [smem:[#allocation34_spill]] %s1997_s10 }
   0x8   :  { %16 = vsyncpa [#allocation3], 0 }
   0x9   :  { %18 = vsyncpa [#allocation3 + $0x1], 0 }
   0xa   :  { %19 = vsyncpa [#allocation6], 0 }
   0xb   :  { %21 = vsyncpa [#allocation6 + $0x1], 0 }
   0xc   :  { %22 = vsyncpa [#allocation9], 0 }
   0xd   :  { %23 = vsyncpa [#allocation12], 0 }
   0xe   :  { %24 = vsyncpa [#allocation4], 0 }
   0xf   :  { %26 = vsyncpa [#allocation4 + $0x1], 0 }
  0x10   :  { %27 = vsyncpa [#allocation16], 0 }
  0x11   :  { %29 = vsyncpa [#allocation16 + $0x1], 0  ;;  %s1638_s13 = smov 0   ;;  %s1640_s14 = smov 0  }
  0x12   :  { %s1642_s15 = smov 0   ;;  %s1644_s16 = smov 0  }
  0x13 LB: > { %2024 = sst [smem:[#allocation23_spill]] %s1556_s13  ;;  %s1659_s17 = sadd.s32 4294967295, %s1568_s16   ;;  %s1568_s16 = sphi %s1644_s16, %s2060_s16   ;;  %s1564_s15 = sphi %s1642_s15, %s2062_s15   ;;  %s1560_s14 = sphi %s1640_s14, %s2064_s14   ;;  %s1556_s13 = sphi %s1638_s13, %s2063_s13  }
  0x14   : > { %2025 = sst [smem:[#allocation24_spill]] %s1564_s15  ;;  %s1058_s18 = sadd.s32 4294967294, %s1568_s16  }
  0x15   : > { %p55_p0 = scmp.ne.s32.totalorder %s1560_s14, %s1556_s13  ;;  %p2008_p1 = scmp.eq.s32.totalorder %s1659_s17, 0 }
  0x16   : > { %p257_p2 = scmp.eq.s32.totalorder %s1659_s17, 1  ;;  %p263_p3 = scmp.eq.s32.totalorder %s1058_s18, 1 }
  0x17   : > { %p1668_p4 = por %p2008_p1, %p55_p0  ;;  %p1059_p5 = scmp.ge.s32.totalorder %s1568_s16, 1 }
  0x18   : > { %p1673_p6 = por %p263_p3, %p55_p0  ;;  %p296_p7 = scmp.lt.s32.totalorder %s1568_s16, 3 }
  0x19   : > { %s2026_s19 = scalar_select %p1668_p4, 1, 0 }
  0x1a   : > { %s2027_s20 = scalar_select %p1673_p6, 1, 0 }
  0x1b   : > { %p1678_p8 = pnand %p1059_p5, %p296_p7  ;;  %s1570_s22 = smov [#allocation8]  }
  0x1c   : > { %2028 = sst [smem:[#allocation25_spill]] %s2027_s20  ;;  %s308_s23 = sshll.u32 %s1570_s22, 4  ;;  %s309_s23 = int_to_ptr.vmem [resolvable:$true] %s308_s23 }
  0x1d   : > { %s2029_s21 = scalar_select %p1678_p8, 1, 0 }
  0x1e   : > { %p1182_p9 = pneg %p1678_p8  ;;  %s1571_s25 = smov [#allocation11]  }
  0x1f   : > { %s332_s26 = sshll.u32 %s1571_s25, 4  ;;  %s1285_s27 = scalar_lea.vmem %s309_s23, 256  ;;  %s333_s26 = int_to_ptr.vmem [resolvable:$true] %s332_s26 }
  0x20   : > { %p1687_p11 = pnand %p1182_p9, %p2008_p1  ;;  %p1286_p13 = scmp.ne.s32.totalorder %s309_s23, %s1285_s27 }
  0x21   : > { %p1293_p5 = scmp.lt.s32.totalorder %s309_s23, %s309_s23  ;;  %p1294_p7 = scmp.lt.s32.totalorder %s1285_s27, %s1285_s27 }
  0x22   : > { %s2030_s24 = scalar_select %p1687_p11, 1, 0 }
  0x23   : > { %p2009_p12 = pneg %p1687_p11  ;;  %p1295_p10 = por %p1294_p7, %p1293_p5 }
  0x25   : > { %p1288_p0 = pnand %p1286_p13, %p2009_p12 }
  0x27   : > { %p1289_p3 = pneg %p1288_p0 }
  0x29   : > { %p1296_p9 = pnand %p1295_p10, %p1289_p3 }
  0x2b   : > { %1299 = shalt.err (!%p1296_p9)
}
  0x2c   : > { %s1998_s28 = smov 64   ;;  %s2000_s29 = smov 4  }
  0x2d   : > { %s2031_s3 = sld [smem:[#allocation29_spill]]  ;;  %s1311_s12 = scalar_lea.vmem %s333_s26, 192 }
  0x2e   : > { %p1312_p13 = scmp.ne.s32.totalorder %s333_s26, %s1311_s12  ;;  %p1319_p10 = scmp.lt.s32.totalorder %s333_s26, %s333_s26 }
  0x2f   : > { %p1320_p3 = scmp.lt.s32.totalorder %s1311_s12, %s1311_s12 }
  0x30   : > { %p1314_p0 = pnand %p1312_p13, %p2009_p12 }
  0x31   : > { %p1321_p7 = por %p1320_p3, %p1319_p10 }
  0x32   : > { %p1315_p5 = pneg %p1314_p0 }
  0x33   : > { %1185 = dma.hbm_to_vmem [thread:$0]  (!%p1687_p11), %s2031_s3, 256, %s309_s23, [#allocation9], %s1998_s28, %s1998_s28, %s2000_s29  }
  0x34   : > { %p1322_p9 = pnand %p1321_p7, %p1315_p5 }
  0x36   : > { %1325 = shalt.err (!%p1322_p9)
}
  0x37   : > { %s2032_s5 = sld [smem:[#allocation31_spill]]  ;;  %s1716_s23 = sadd.s32 1, %s1568_s16  }
  0x38   : > { %2033 = sst [smem:[#allocation26_spill]] %s1716_s23  ;;  %s42_s25 = sadd.s32 1, %s1564_s15 }
  0x39   : > { %s39_s27 = ssub.s32 %s1568_s16, %s1716_s23  ;;  %p49_p13 = scmp.ne.s32.totalorder %s1564_s15, %s1560_s14 }
  0x3a   : > { %p40_p0 = scmp.eq.s32.totalorder %s39_s27, 0  ;;  %p50_p5 = scmp.eq.s32.totalorder %s1568_s16, 0 }
  0x3b   : > { %p1726_p10 = por %p257_p2, %p49_p13  ;;  %p1216_p3 = scmp.lt.s32.totalorder %s1568_s16, 2 }
  0x3c   : > { %s1732_s11 = scalar_select %p40_p0, %s1564_s15, %s42_s25  }
  0x3d   : > { %1191 = dma.hbm_to_vmem [thread:$0]  (!%p1687_p11), %s2032_s5, 192, %s333_s26, [#allocation12], %s1998_s28, %s1998_s28, %s2000_s29  }
  0x3e   : > { %s2034_s30 = scalar_select %p1726_p10, 1, 0 }
  0x3f   : > { %2035 = sst [smem:[#allocation27_spill]] %s1732_s11  ;;  %p51_p7 = por %p50_p5, %p49_p13 }
  0x40   : > { %s1735_s12 = sand.u32 1, %s1564_s15   ;;  %s381_s26 = sand.u32 1, %s1568_s16  }
  0x41   : > { %s2007_s18 = sshll.u32 %s1735_s12, 3  ;;  %p1739_p9 = pnand %p1216_p3, %p51_p7 }
  0x42   : > { %s1105_s27 = sshll.u32 %s1568_s16, 7  ;;  %s2037_s1 = sld [smem:[#allocation28_spill]] }
  0x43   : > { %s385_s25 = scalar_lea.vmem [#allocation5], %s2007_s18  ;;  %s1756_s23 = scalar_lea.hbm %s1989_s2, %s1105_s27 }
  0x44   : > { %s392_s5 = sshll.u32 %s385_s25, 4  ;;  %s1758_s20 = scalar_lea.sflag [#allocation6], %s381_s26  ;;  %s1751_s5 = int_to_ptr.vmem [resolvable:$true] %s392_s5 }
  0x45   : > { %p1764_p13 = pneg %p1739_p9 }
  0x48   : > { %s1747_s3 = scalar_lea.hbm %s2037_s1, %s1105_s27  ;;  %s1331_s18 = scalar_lea.hbm %s2037_s1, 256 }
  0x49   : > { %s1326_s13 = scalar_lea.hbm %s1747_s3, 128  ;;  %p1332_p3 = scmp.lt.s32.totalorder %s1747_s3, %s2037_s1 }
  0x4a   : > { %p1327_p2 = scmp.ne.s32.totalorder %s1747_s3, %s1326_s13  ;;  %p1333_p7 = scmp.lt.s32.totalorder %s1331_s18, %s1326_s13 }
  0x4c   : > { %p1329_p0 = pnand %p1764_p13, %p1327_p2  ;;  %p1334_p1 = por %p1333_p7, %p1332_p3 }
  0x4e   : > { %p1330_p5 = pneg %p1329_p0 }
  0x50   : > { %p1335_p12 = pnand %p1334_p1, %p1330_p5 }
  0x52   : > { %1338 = shalt.err (!%p1335_p12)
}
  0x53   : > { %s1339_s26 = scalar_lea.vmem %s1751_s5, 128  ;;  %s1574_s27 = smov [#allocation5]  }
  0x54   : > { %p1340_p6 = scmp.ne.s32.totalorder %s1751_s5, %s1339_s26  ;;  %s1344_s29 = sshll.u32 %s1574_s27, 4  ;;  %s1345_s29 = int_to_ptr.vmem [resolvable:$false] %s1344_s29 }
  0x55   : > { %s1346_s25 = scalar_lea.vmem %s1345_s29, 256  ;;  %p1347_p10 = scmp.lt.s32.totalorder %s1751_s5, %s1345_s29 }
  0x56   : > { %p1342_p2 = pnand %p1340_p6, %p1764_p13  ;;  %p1348_p4 = scmp.lt.s32.totalorder %s1346_s25, %s1339_s26 }
  0x58   : > { %p1343_p0 = pneg %p1342_p2  ;;  %p1349_p8 = por %p1348_p4, %p1347_p10 }
  0x5a   : > { %p1350_p11 = pnand %p1349_p8, %p1343_p0 }
  0x5c   : > { %1353 = shalt.err (!%p1350_p11)
}
  0x5d   : > { %s2039_s13 = smov 4   ;;  %s2040_s18 = smov 64  }
  0x5e   : > { %1201 = dma.hbm_to_vmem [thread:$0]  (!%p1739_p9), %s1747_s3, 128, %s1751_s5, %s1758_s20, %s2040_s18, %s2040_s18, %s2039_s13  }
  0x5f   : > { %s2041_s15 = sshll.u32 %s1735_s12, 3  ;;  %s1575_s26 = smov [#allocation10]  }
  0x60   : > { %s406_s11 = scalar_lea.vmem [#allocation7], %s2041_s15  ;;  %s322_s29 = sshll.u32 %s1575_s26, 4  ;;  %s323_s29 = int_to_ptr.vmem [resolvable:$true] %s322_s29 }
  0x61   : > { %s413_s27 = sshll.u32 %s406_s11, 4  ;;  %s1365_s25 = scalar_lea.vmem %s323_s29, 16  ;;  %s1792_s27 = int_to_ptr.vmem [resolvable:$true] %s413_s27 }
  0x62   : > { %p1366_p1 = scmp.ne.s32.totalorder %s323_s29, %s1365_s25  ;;  %p2042_p4 = scmp.ne.s32.totalorder %s2030_s24, 0 }
  0x63   : > { %s1372_s1 = scalar_lea.vmem %s323_s29, 32  ;;  %p1373_p12 = scmp.lt.s32.totalorder %s323_s29, %s323_s29 }
  0x64   : > { %p2043_p6 = pneg %p2042_p4  ;;  %p1374_p10 = scmp.lt.s32.totalorder %s1372_s1, %s1365_s25 }
  0x66   : > { %p1368_p8 = pnand %p1366_p1, %p2043_p6  ;;  %p1375_p5 = por %p1374_p10, %p1373_p12 }
  0x68   : > { %p1369_p11 = pneg %p1368_p8 }
  0x6a   : > { %p1376_p3 = pnand %p1375_p5, %p1369_p11 }
  0x6c   : > { %1379 = shalt.err (!%p1376_p3)
}
  0x6d   : > { %s2044_s4 = sld [smem:[#allocation30_spill]]  ;;  %s1576_s15 = smov [#allocation13]  }
  0x6e   : > { %s346_s11 = sshll.u32 %s1576_s15, 4  ;;  %s1065_s26 = sshll.u32 %s1735_s12, 2  ;;  %s347_s11 = int_to_ptr.vmem [resolvable:$true] %s346_s11 }
  0x6f   : > { %s1391_s9 = scalar_lea.vmem %s347_s11, 16  ;;  %p2045_p2 = pmov %p2043_p6 }
  0x70   : > { %p1392_p7 = scmp.ne.s32.totalorder %s347_s11, %s1391_s9  ;;  %s1398_s1 = scalar_lea.vmem %s347_s11, 32 }
  0x71   : > { %p1399_p6 = scmp.lt.s32.totalorder %s347_s11, %s347_s11  ;;  %p1400_p8 = scmp.lt.s32.totalorder %s1398_s1, %s1391_s9 }
  0x72   : > { %p1394_p0 = pnand %p1392_p7, %p2045_p2 }
  0x73   : > { %1188 = dma.hbm_to_vmem [thread:$0]  (!%p2042_p4), %s2044_s4, 16, %s323_s29, [#allocation9]  }
  0x74   : > { %p1395_p1 = pneg %p1394_p0  ;;  %p1401_p11 = por %p1400_p8, %p1399_p6 }
  0x76   : > { %p1402_p12 = pnand %p1401_p11, %p1395_p1 }
  0x78   : > { %1405 = shalt.err (!%p1402_p12)
}
  0x79   : > { %s2046_s6 = sld [smem:[#allocation32_spill]]  ;;  %s1066_s3 = sshll.u32 %s1568_s16, 6 }
  0x7a   : > { %s1815_s4 = scalar_lea.hbm %s1987_s0, %s1066_s3  ;;  %s367_s9 = scalar_lea.vmem [#allocation2], %s1065_s26 }
  0x7b   : > { %s374_s1 = sshll.u32 %s367_s9, 4  ;;  %s364_s24 = scalar_lea.sflag [#allocation3], %s1735_s12  ;;  %s375_s1 = int_to_ptr.vmem [resolvable:$true] %s374_s1 }
  0x7c   : > { %s1406_s10 = scalar_lea.hbm %s1815_s4, 64  ;;  %s1411_s29 = scalar_lea.hbm %s1987_s0, 128 }
  0x7d   : > { %p1407_p10 = scmp.ne.s32.totalorder %s1815_s4, %s1406_s10  ;;  %p1413_p7 = scmp.lt.s32.totalorder %s1411_s29, %s1406_s10 }
  0x7f   : > { %1194 = dma.hbm_to_vmem [thread:$0]  (!%p2042_p4), %s2046_s6, 16, %s347_s11, [#allocation12]  }
  0x80   : > { %p1409_p5 = pnand %p1407_p10, %p1764_p13  ;;  %p1412_p4 = scmp.lt.s32.totalorder %s1815_s4, %s1987_s0 }
  0x82   : > { %p1410_p3 = pneg %p1409_p5  ;;  %p1414_p2 = por %p1413_p7, %p1412_p4 }
  0x84   : > { %p1415_p0 = pnand %p1414_p2, %p1410_p3 }
  0x86   : > { %1418 = shalt.err (!%p1415_p0)
}
  0x87   : > { %s1419_s26 = scalar_lea.vmem %s375_s1, 64  ;;  %s1577_s12 = smov [#allocation2]  }
  0x88   : > { %p1420_p1 = scmp.ne.s32.totalorder %s375_s1, %s1419_s26  ;;  %s1424_s3 = sshll.u32 %s1577_s12, 4  ;;  %s1425_s3 = int_to_ptr.vmem [resolvable:$false] %s1424_s3 }
  0x89   : > { %s1426_s15 = scalar_lea.vmem %s1425_s3, 128  ;;  %p1427_p11 = scmp.lt.s32.totalorder %s375_s1, %s1425_s3 }
  0x8a   : > { %p1422_p6 = pnand %p1420_p1, %p1764_p13  ;;  %p1428_p12 = scmp.lt.s32.totalorder %s1426_s15, %s1419_s26 }
  0x8c   : > { %p1423_p8 = pneg %p1422_p6  ;;  %p1429_p10 = por %p1428_p12, %p1427_p11 }
  0x8e   : > { %p1430_p5 = pnand %p1429_p10, %p1423_p8 }
  0x90   : > { %1433 = shalt.err (!%p1430_p5)
}
  0x91   : > { %1198 = dma.hbm_to_vmem [thread:$0]  (!%p1739_p9), %s1815_s4, 64, %s375_s1, %s364_s24  }
  0x92   : > { %s1434_s6 = scalar_lea.hbm %s1756_s23, 128  ;;  %s1439_s25 = scalar_lea.hbm %s1989_s2, 256 }
  0x93   : > { %p1435_p3 = scmp.ne.s32.totalorder %s1756_s23, %s1434_s6  ;;  %p1440_p2 = scmp.lt.s32.totalorder %s1756_s23, %s1989_s2 }
  0x94   : > { %p1441_p0 = scmp.lt.s32.totalorder %s1439_s25, %s1434_s6 }
  0x95   : > { %p1437_p4 = pnand %p1435_p3, %p1764_p13 }
  0x96   : > { %p1442_p1 = por %p1441_p0, %p1440_p2 }
  0x97   : > { %p1438_p7 = pneg %p1437_p4 }
  0x99   : > { %p1443_p6 = pnand %p1442_p1, %p1438_p7 }
  0x9b   : > { %1446 = shalt.err (!%p1443_p6)
}
  0x9c   : > { %s1447_s4 = scalar_lea.vmem %s1792_s27, 128  ;;  %s1578_s1 = smov [#allocation7]  }
  0x9d   : > { %p1448_p8 = scmp.ne.s32.totalorder %s1792_s27, %s1447_s4  ;;  %s1452_s24 = sshll.u32 %s1578_s1, 4  ;;  %s1453_s24 = int_to_ptr.vmem [resolvable:$false] %s1452_s24 }
  0x9e   : > { %s1454_s5 = scalar_lea.vmem %s1453_s24, 256  ;;  %p1455_p10 = scmp.lt.s32.totalorder %s1792_s27, %s1453_s24 }
  0x9f   : > { %p1450_p11 = pnand %p1448_p8, %p1764_p13  ;;  %p1456_p5 = scmp.lt.s32.totalorder %s1454_s5, %s1447_s4 }
  0xa1   : > { %p1451_p12 = pneg %p1450_p11  ;;  %p1457_p3 = por %p1456_p5, %p1455_p10 }
  0xa3   : > { %p1458_p4 = pnand %p1457_p3, %p1451_p12 }
  0xa5   : > { %1461 = shalt.err (!%p1458_p4)
}
  0xa6   : > { %1204 = dma.hbm_to_vmem [thread:$0]  (!%p1739_p9), %s1756_s23, 128, %s1792_s27, %s1758_s20, %s2040_s18, %s2040_s18, %s2039_s13  }
  0xa7   : > { %p2047_p13 = scmp.ne.s32.totalorder %s2029_s21, 0 }
  0xa8   : > { %s1861_s28 = sand.u32 (!%p2047_p13), 1, %s1560_s14   ;;  %p2048_p7 = scmp.ne.s32.totalorder (!%p2047_p13), %s2026_s19, 0 }
  0xa9   : > { %425 = sbr.rel (%p2047_p13) target bundleno = 1120 (0x460), region = 56  ;;  %s1074_s26 = sshll.u32 (!%p2047_p13), %s1861_s28, 2 }
  0xaa   : > { %s428_s12 = scalar_lea.sflag (!%p2047_p13), [#allocation3], %s1861_s28  ;;  %s1865_s3 = scalar_lea.vmem (!%p2047_p13), [#allocation2], %s1074_s26 }
  0xae   : > { %1531 = dma.done.wait (%p2048_p7), %s428_s12, 64  }
  0xaf   : > { %1533 = vsyncadd (%p2048_p7), %s428_s12, 4294967232  ;;  %s436_s20 = sand.u32 1, %s1659_s17   ;;  %s1873_s21 = sshll.u32 %s1861_s28, 3 }
  0xb0   : > { %s437_s23 = scalar_lea.sflag [#allocation6], %s436_s20  ;;  %s440_s22 = scalar_lea.vmem [#allocation5], %s1873_s21 }
  0xb1   : > { %1535 = dma.done.wait (%p2048_p7), %s437_s23, 256  }
  0xb2   : > { %1537 = vsyncadd (%p2048_p7), %s437_s23, 4294967040  ;;  %s449_s13 = scalar_lea.vmem [#allocation7], %s1873_s21  ;;  %p2049_p9 = scmp.eq.s32.totalorder %s1659_s17, 0 }
  0xb4   : > { %1539 = dma.done.wait (%p2049_p9), [#allocation9], 272   ;;  %p2050_p2 = pmov %p2049_p9 }
  0xb6   : > { %1541 = vsyncadd (%p2050_p2), [#allocation9], 4294967024  ;;  %p2051_p0 = pmov %p2050_p2 }
  0xb8   : > { %1543 = dma.done.wait (%p2051_p0), [#allocation12], 208   ;;  %p2052_p1 = pmov %p2051_p0 }
  0xb9   : > { %v1579_v0 = vmov 0.0   ;;  %vm1580_vm0 = vmmov 0   ;;  %vm618_vm1 = vcmask 1043456   ;;  %v1262_v1 = vld [vmem:[#allocation11 + $0x8] ss:$0 sps:$4 sm:$0xff]   ;;  %v1264_v3 = vld [vmem:[#allocation11] sm:$0xff]  }
  0xba   : > { %1545 = vsyncadd (%p2052_p1), [#allocation12], 4294967088  ;;  %1128 = vmatprep.subr.bf16.mxu1 %v1579_v0  ;;  %1120 = vmatprep.subr.bf16.mxu0 %v1579_v0  ;;  %v620_v2 = vsel %vm618_vm1, %v1262_v1, 0  ;;  %v1265_v4 = vld [vmem:[#allocation8 + $0x8] sm:$0xff]   ;;  %v1263_v5 = vld [vmem:[%s1994_s7 + $0x8] ss:$0 sps:$4 sm:$0xff]  }
  0xbb   : > { %1132 = vmatprep.mubr.msk.bf16.mxu1 %vm1580_vm0, %v1579_v0  ;;  %1124 = vmatprep.mubr.msk.bf16.mxu0 %vm1580_vm0, %v1579_v0  ;;  %v1266_v6 = vld [vmem:[%s440_s22] sm:$0xff]   ;;  %vm614_vm2 = vcmask 195584   ;;  %v518_v8 = vld [vmem:[%s1865_s3] sm:$0xf]  ;;  %vm546_vm3 = vcmask 261120   ;;  %v691_v9 = vsel %vm618_vm1, %v1263_v5, 0 }
  0xbc   : > { %1129 = vmatpush3.bf16.msra.mxu1 %v620_v2  ;;  %1121 = vmatpush3.bf16.msra.mxu0 %v1265_v4  ;;  %v1267_v7 = vld [vmem:[#allocation8] sm:$0xff]   ;;  %v1087_v11 = vld [vmem:[#allocation13] ss:$0 sm:$0xff]  ;;  %v1083_v19 = vld [vmem:[#allocation10] ss:$0 sm:$0xff]  ;;  %vm783_vm4 = vcmask 130048  }
  0xbd   : > { %1130 = vmatprep.subr.bf16.mxu1 %v1579_v0  ;;  %1122 = vmatprep.subr.bf16.mxu0 %v1579_v0  ;;  %v1268_v26 = vld [vmem:[%s1994_s7] sm:$0xff]   ;;  %v1269_v27 = vld [vmem:[%s449_s13] sm:$0xff]   ;;  %s516_s9 = scalar_lea.vmem [#allocation15], %s1873_s21  ;;  %s1101_s25 = sshll.u32 %s1659_s17, 7 }
  0xbe   : > { %v1092_v40 = vld [vmem:[%s1995_s8] ss:$0 sm:$0xff]  ;;  %s2053_s4 = sld [smem:[#allocation34_spill]]  ;;  %s875_s24 = sshll.u32 %s516_s9, 4  ;;  %s876_s24 = int_to_ptr.vmem [resolvable:$true] %s875_s24 }
  0xbf   : > { %s849_s5 = scalar_lea.sflag [#allocation16], %s1861_s28  ;;  %s1462_s26 = scalar_lea.vmem %s876_s24, 128 }
  0xc0   : > { %1131 = vmatpush3.bf16.msra.mxu1 %v1264_v3  ;;  %1123 = vmatpush3.bf16.msra.mxu0 %v1267_v7  ;;  %p1463_p6 = scmp.ne.s32.totalorder %s876_s24, %s1462_s26  ;;  %p2054_p8 = scmp.ne.s32.totalorder %s2034_s30, 0 }
  0xc1   : > { %1144 = vmatprep.subr.bf16.mxu1 %v1579_v0  ;;  %1136 = vmatprep.subr.bf16.mxu0 %v1579_v0  ;;  %s1581_s12 = smov [#allocation15]  }
  0xc2   : > { %p1464_p11 = pnand %p1463_p6, %p2054_p8  ;;  %s1466_s3 = sshll.u32 %s1581_s12, 4  ;;  %s1467_s3 = int_to_ptr.vmem [resolvable:$false] %s1466_s3 }
  0xc3   : > { %1133 = vmatmul.mubr.msk.bf16.vlgmr.msra.gmra.mxu1 %vm614_vm2, %v1266_v6  ;;  %1125 = vmatmul.mubr.msk.bf16.vlgmr.msra.gmra.mxu0 %vm546_vm3, %v518_v8  ;;  %s1468_s20 = scalar_lea.vmem %s1467_s3, 256  ;;  %p1469_p10 = scmp.lt.s32.totalorder %s876_s24, %s1467_s3 }
  0xc4   : > { %1146 = vmatprep.mubr.msk.bf16.mxu1 %vm1580_vm0, %v1579_v0  ;;  %1137 = vmatpush3.bf16.msra.mxu0 %v691_v9  ;;  %s873_s1 = scalar_lea.hbm %s2053_s4, %s1101_s25  ;;  %p1465_p12 = pneg %p1464_p11 }
  0xc5   : > { %1140 = vmatprep.mubr.msk.bf16.mxu0 %vm1580_vm0, %v1579_v0  ;;  %1138 = vmatprep.subr.bf16.mxu0 %v1579_v0  ;;  %p1470_p5 = scmp.lt.s32.totalorder %s1468_s20, %s1462_s26 }
  0xc7   : > { %p1471_p3 = por %p1470_p5, %p1469_p10 }
  0xc8   : > { %1139 = vmatpush3.bf16.msra.mxu0 %v1268_v26 }
  0xc9   : > { %1150 = vmatprep.subr.bf16.mxu0 %v1579_v0  ;;  %p1472_p4 = pnand %p1471_p3, %p1465_p12 }
  0xcb   : > { %1141 = vmatmul.mubr.msk.bf16.vlgmr.msra.gmra.mxu0 %vm614_vm2, %v1269_v27 }
  0xcc   : > { %1152 = vmatprep.mubr.msk.bf16.mxu0 %vm1580_vm0, %v1579_v0 }
 0x183   : > { %v656_v10 = vpop.f32.mrf.mxu1  ;;  %v584_v13 = vpop.f32.mrf.mxu0 }
 0x184   : > { %v657_v16 = vadd.f32 %v1087_v11, %v656_v10  ;;  %v585_v23 = vadd.f32 %v1083_v19, %v584_v13 }
 0x185   : > { %v1134_v12 = vpop.f32.mrf.mxu1  ;;  %v1126_v15 = vpop.f32.mrf.mxu0 }
 0x186   : > { %v734_v25 = vpack.c.bf16 %v585_v23, %v585_v23 }
 0x187   : > { %v659_v14 = vpop.f32.mrf.mxu1  ;;  %v587_v20 = vpop.f32.mrf.mxu0 }
 0x188   : > { %v660_v17 = vadd.f32 %v1087_v11, %v659_v14 }
 0x189   : > { %v1135_v18 = vpop.f32.mrf.mxu1  ;;  %v1127_v22 = vpop.f32.mrf.mxu0 }
 0x18a   : > { %v735_v21 = vpack.c.bf16 %v660_v17, %v657_v16 }
 0x18b   : > { %v727_v33 = vpop.f32.mrf.mxu0 }
 0x18c   : > { %v741_v24 = vsel %vm546_vm3, %v735_v21, 0  ;;  %v728_v42 = vadd.f32 %v1092_v40, %v727_v33 }
 0x18d   : > { %1145 = vmatpush3.bf16.xpose.msra.mxu1 %v741_v24  ;;  %v1142_v34 = vpop.f32.mrf.mxu0 }
 0x18f   : > { %v730_v41 = vpop.f32.mrf.mxu0 }
 0x190   : > { %v731_v44 = vadd.f32 %v1092_v40, %v730_v41 }
 0x191   : > { %v1143_v43 = vpop.f32.mrf.mxu0 }
 0x192   : > { %v736_v45 = vpack.c.bf16 %v731_v44, %v728_v42 }
 0x194   : > { %1147 = vmatmul.mubr.msk.bf16.vlgmr.msra.gmra.mxu1 %vm546_vm3, %v734_v25  ;;  %1151 = vmatpush3.bf16.msra.mxu0 %v736_v45 }
 0x254   : > { %v777_v28 = vpop.f32.mrf.mxu1 }
 0x255   : > { %v784_v29 = vsel %vm783_vm4, %v777_v28, -inf }
 0x256   : > { %785 = vmax.xlane.f32.xlu0 %v784_v29  ;;  %v1148_v30 = vpop.f32.mrf.mxu1 }
 0x258   : > { %v780_v31 = vpop.f32.mrf.mxu1 }
 0x25a   : > { %v1149_v32 = vpop.f32.mrf.mxu1 }
 0x2df   : > { %v786_v35 = vpop.xlane.xlu0 %785 }
 0x2e0   : > { %v787_v36 = vsub.f32 %v777_v28, %v786_v35 }
 0x2e2   : > { %v788_v37 = vmul.f32 1.442695, %v787_v36 }
 0x2e4   : > { %1270 = vpow2.f32 %v788_v37 }
 0x2f1   : > { %v1271_v38 = vpop.eup %1270 }
 0x2f2   : > { %v790_v39 = vsel %vm783_vm4, %v1271_v38, 0.0 }
 0x2f3   : > { %791 = vadd.xlane.f32.xlu0 %v790_v39 }
 0x37c   : > { %v792_v46 = vpop.xlane.xlu0 %791 }
 0x37d   : > { %1272 = vrcp.f32 %v792_v46 }
 0x38a   : > { %v1273_v47 = vpop.eup %1272 }
 0x38b   : > { %v794_v48 = vmul.f32 %v1273_v47, %v1271_v38 }
 0x38d   : > { %v795_v49 = vpack.c.bf16 %v794_v48, %v794_v48  ;;  %v839_v50 = vsel %vm783_vm4, %v794_v48, 0.0 }
 0x38e   : > { %841 = vst [vmem:[%s516_s9] sm:$0xff] %v839_v50 }
 0x38f   : > { %1153 = vmatmul.mubr.msk.bf16.vlgmr.msra.gmra.mxu0 %vm783_vm4, %v795_v49 }
 0x390   : > { %1475 = shalt.err (!%p1472_p4)
}
 0x391   : > { %s1476_s23 = scalar_lea.hbm %s873_s1, 128  ;;  %s1480_s19 = scalar_lea.hbm %s2053_s4, 256 }
 0x392   : > { %p1477_p13 = scmp.ne.s32.totalorder %s873_s1, %s1476_s23  ;;  %p1481_p2 = scmp.lt.s32.totalorder %s873_s1, %s2053_s4 }
 0x393   : > { %p1482_p0 = scmp.lt.s32.totalorder %s1480_s19, %s1476_s23 }
 0x394   : > { %p1478_p7 = pnand %p1477_p13, %p2054_p8 }
 0x395   : > { %p1483_p1 = por %p1482_p0, %p1481_p2 }
 0x396   : > { %p1479_p9 = pneg %p1478_p7 }
 0x398   : > { %p1484_p6 = pnand %p1483_p1, %p1479_p9 }
 0x39a   : > { %1487 = shalt.err (!%p1484_p6)
}
 0x39b   : > { %1179 = dma.vmem_to_hbm [thread:$0]  (%p2054_p8), %s876_s24, 128, %s873_s1, %s849_s5  }
 0x39c   : > { %s509_s15 = scalar_lea.vmem [#allocation14], %s1873_s21  ;;  %s2055_s11 = sld [smem:[#allocation33_spill]] }
 0x39d   : > { %s862_s6 = sshll.u32 %s509_s15, 4  ;;  %s844_s26 = scalar_lea.sflag [#allocation4], %s1861_s28  ;;  %s1945_s6 = int_to_ptr.vmem [resolvable:$true] %s862_s6 }
 0x39e   : > { %s1488_s1 = scalar_lea.vmem %s1945_s6, 128  ;;  %s1582_s17 = smov [#allocation14]  }
 0x39f   : > { %p1489_p11 = scmp.ne.s32.totalorder %s1945_s6, %s1488_s1  ;;  %s1492_s21 = sshll.u32 %s1582_s17, 4  ;;  %s1493_s21 = int_to_ptr.vmem [resolvable:$false] %s1492_s21 }
 0x3a0   : > { %p1495_p5 = scmp.lt.s32.totalorder %s1945_s6, %s1493_s21 }
 0x3a1   : > { %p1490_p12 = pnand %p1489_p11, %p2054_p8 }
 0x3a2   : > { %s1943_s29 = scalar_lea.hbm %s2055_s11, %s1101_s25  ;;  %s1494_s25 = scalar_lea.vmem %s1493_s21, 256 }
 0x3a3   : > { %p1491_p10 = pneg %p1490_p12  ;;  %p1496_p3 = scmp.lt.s32.totalorder %s1494_s25, %s1488_s1 }
 0x3a5   : > { %p1497_p4 = por %p1496_p3, %p1495_p5 }
 0x3a7   : > { %p1498_p13 = pnand %p1497_p4, %p1491_p10 }
 0x44f   : > { %v833_v51 = vpop.f32.mrf.mxu0 }
 0x450   : > { %v840_v52 = vsel %vm546_vm3, %v833_v51, 0.0 }
 0x451   : > { %842 = vst [vmem:[%s509_s15] sm:$0xff] %v840_v52  ;;  %v1154_v53 = vpop.f32.mrf.mxu0 }
 0x452   : > { %1501 = shalt.err (!%p1498_p13)
}
 0x453   : > { %s1502_s24 = scalar_lea.hbm %s1943_s29, 128  ;;  %s1506_s12 = scalar_lea.hbm %s2055_s11, 256 }
 0x454   : > { %p1503_p7 = scmp.ne.s32.totalorder %s1943_s29, %s1502_s24  ;;  %p1507_p0 = scmp.lt.s32.totalorder %s1943_s29, %s2055_s11 }
 0x455   : > { %p1508_p1 = scmp.lt.s32.totalorder %s1506_s12, %s1502_s24 }
 0x456   : > { %p1504_p9 = pnand %p1503_p7, %p2054_p8 }
 0x457   : > { %p1509_p6 = por %p1508_p1, %p1507_p0 }
 0x458   : > { %p1505_p2 = pneg %p1504_p9 }
 0x45a   : > { %p1510_p11 = pnand %p1509_p6, %p1505_p2 }
 0x45c   : > { %1513 = shalt.err (!%p1510_p11)
}
 0x45d   : > { %1178 = dma.vmem_to_hbm [thread:$0]  (%p2054_p8), %s1945_s6, 128, %s1943_s29, %s844_s26   ;;  %v836_v54 = vpop.f32.mrf.mxu0 }
 0x45f   : > { %v1155_v55 = vpop.f32.mrf.mxu0 }
 0x460 PF: > { %s2056_s23 = sld [smem:[#allocation23_spill]]  ;;  %p2059_p10 = scmp.ge.s32.totalorder %s1568_s16, 2 }
 0x461   : > { %s2057_s22 = sld [smem:[#allocation25_spill]] }
 0x466   : > { %s887_s13 = sand.u32 1, %s2056_s23  }
 0x467   : > { %p2058_p12 = scmp.ne.s32.totalorder %s2057_s22, 0  ;;  %s888_s19 = scalar_lea.sflag [#allocation4], %s887_s13 }
 0x469   : > { %p1206_p5 = pnand %p2059_p10, %p2058_p12 }
 0x46b   : > { %p1207_p3 = pneg %p1206_p5 }
 0x46d   : > { %1547 = dma.done.wait (%p1207_p3), %s888_s19, 128  }
 0x46e   : > { %1549 = vsyncadd (%p1207_p3), %s888_s19, 4294967168  ;;  %s897_s18 = scalar_lea.sflag [#allocation16], %s887_s13 }
 0x46f   : > { %1551 = dma.done.wait (%p1207_p3), %s897_s18, 128  }
 0x470   : > { %1553 = vsyncadd (%p1207_p3), %s897_s18, 4294967168  ;;  %s2060_s16 = sld [smem:[#allocation26_spill]]  ;;  %s2063_s13 = smov %s1560_s14 }
 0x471   : > { %s2061_s30 = sld [smem:[#allocation24_spill]] }
 0x472   : > { %s2062_s15 = sld [smem:[#allocation27_spill]] }
 0x476   : > { %p32_p8 = scmp.ge.s32.totalorder %s2060_s16, 4  }
 0x477   : > { %s2064_s14 = smov %s2061_s30 }
 0x478   :  { %34 = sbr.rel (!%p32_p8) target bundleno = 19 (0x13), region = 158 }
 0x47d   :  { %902 = vsyncpa [#allocation3], 1 }
 0x47e   :  { %904 = vsyncpa [#allocation3 + $0x1], 1 }
 0x47f   :  { %905 = vsyncpa [#allocation6], 1 }
 0x480   :  { %907 = vsyncpa [#allocation6 + $0x1], 1 }
 0x481   :  { %908 = vsyncpa [#allocation9], 1 }
 0x482   :  { %909 = vsyncpa [#allocation12], 1 }
 0x483   :  { %910 = vsyncpa [#allocation4], 1 }
 0x484   :  { %912 = vsyncpa [#allocation4 + $0x1], 1 }
 0x485   :  { %913 = vsyncpa [#allocation16], 1 }
 0x486   :  { %915 = vsyncpa [#allocation16 + $0x1], 1 }

</bundles_post_ra>
